<compile_context>
chip_gen: v7x
topology: tpu7x:2x2x1
jax: 0.10.0
libtpu: 0.0.40
codegen_flags: <defaults>
</compile_context>

<pallas_src>
import math
import functools

import jax
import jax.numpy as jnp
from jax.experimental import pallas as pl
from jax.experimental.pallas import tpu as pltpu


# Matmul operand dtype. Keep f32 for exact parity with the PyTorch module.
# On v6e / v7x set to jnp.bfloat16 for ~2x MXU throughput and half the
# HBM/VMEM traffic (accumulation stays f32 via preferred_element_type).
# Keep f32 on v5e (no bf16 VPU/EUP path for the elementwise epilogues).
MATMUL_DTYPE = jnp.float32

# Scoped-VMEM request with headroom (stays under v7x's 64 MiB physical VMEM).
_VMEM_LIMIT = 48 * 1024 * 1024

_LN_EPS = 1e-5  # PyTorch LayerNorm default


# ------------------------------ tiling helpers -------------------------------

def _round_up(x, m):
    return ((x + m - 1) // m) * m


def _tile_and_pad_dim(dim, target, align):
    """Return (tile, padded_dim).

    If dim <= target, a single full-dim block is used (always legal regardless
    of (8,128) alignment). Otherwise pick an `align`-multiple tile near
    `target` that evenly divides the (minimally) padded dim.
    """
    if dim <= target:
        return dim, dim
    nblocks = -(-dim // target)
    tile = _round_up(-(-dim // nblocks), align)
    return tile, _round_up(dim, tile)


def _pad2d(x, rows, cols):
    r, c = x.shape
    if rows == r and cols == c:
        return x
    return jnp.pad(x, ((0, rows - r), (0, cols - c)))


def _pad_rows(x, rows):
    r = x.shape[0]
    if rows == r:
        return x
    return jnp.pad(x, ((0, rows - r), (0, 0)))


# ----------------------------- Pallas kernels --------------------------------

def _linear_kernel(x_ref, w_ref, b_ref, o_ref, acc_ref, *, relu):
    k = pl.program_id(2)

    @pl.when(k == 0)
    def _():
        acc_ref[...] = jnp.zeros_like(acc_ref)

    x = x_ref[...].astype(MATMUL_DTYPE)
    w = w_ref[...].astype(MATMUL_DTYPE)
    acc_ref[...] += jnp.dot(x, w, preferred_element_type=jnp.float32)

    @pl.when(k == pl.num_programs(2) - 1)
    def _():
        acc = acc_ref[...] + b_ref[...]
        if relu:
            acc = jnp.maximum(acc, 0.0)
        o_ref[...] = acc.astype(o_ref.dtype)


def linear(x2d, w, b, relu=False):
    """x2d: (M, K), w: (K, N), b: (N,) -> (M, N).

    Tiled over (M, N, K); K is the reduction axis with a resident f32
    accumulator; M/N are "parallel" grid axes.
    """
    M, K = x2d.shape
    N = w.shape[1]
    tm, Mp = _tile_and_pad_dim(M, 256, 8)
    tn, Np = _tile_and_pad_dim(N, 512, 128)
    tk, Kp = _tile_and_pad_dim(K, 512, 128)

    xp = _pad2d(x2d, Mp, Kp)          # zero pad keeps the K-reduction exact
    wp = _pad2d(w, Kp, Np)
    bp = jnp.pad(b, (0, Np - N)) if Np > N else b

    grid = (Mp // tm, Np // tn, Kp // tk)
    kernel = functools.partial(_linear_kernel, relu=relu)
    out = pl.pallas_call(
        kernel,
        out_shape=jax.ShapeDtypeStruct((Mp, Np), jnp.float32),
        grid=grid,
        in_specs=[
            pl.BlockSpec((tm, tk), lambda i, j, k: (i, k)),
            pl.BlockSpec((tk, tn), lambda i, j, k: (k, j)),
            pl.BlockSpec((1, tn), lambda i, j, k: (0, j)),
        ],
        out_specs=pl.BlockSpec((tm, tn), lambda i, j, k: (i, j)),
        scratch_shapes=[pltpu.VMEM((tm, tn), jnp.float32)],
        compiler_params=pltpu.CompilerParams(
            dimension_semantics=("parallel", "parallel", "arbitrary"),
            vmem_limit_bytes=_VMEM_LIMIT),
    )(xp, wp, bp.reshape(1, Np))
    if Mp > M or Np > N:
        out = out[:M, :N]
    return out


def _layernorm_math(x, g, b):
    mean = jnp.mean(x, axis=-1, keepdims=True)
    var = jnp.mean(jnp.square(x - mean), axis=-1, keepdims=True)
    xn = (x - mean) * jax.lax.rsqrt(var + _LN_EPS)
    return xn * g + b


def _ln_kernel(x_ref, g_ref, b_ref, o_ref):
    o_ref[...] = _layernorm_math(x_ref[...], g_ref[...], b_ref[...]).astype(o_ref.dtype)


def layernorm(x2d, g, b):
    """x2d: (M, D) -> (M, D); tiled over M (parallel)."""
    M, D = x2d.shape
    tm, Mp = _tile_and_pad_dim(M, 512, 8)
    xp = _pad_rows(x2d, Mp)
    out = pl.pallas_call(
        _ln_kernel,
        out_shape=jax.ShapeDtypeStruct((Mp, D), jnp.float32),
        grid=(Mp // tm,),
        in_specs=[
            pl.BlockSpec((tm, D), lambda i: (i, 0)),
            pl.BlockSpec((1, D), lambda i: (0, 0)),
            pl.BlockSpec((1, D), lambda i: (0, 0)),
        ],
        out_specs=pl.BlockSpec((tm, D), lambda i: (i, 0)),
        compiler_params=pltpu.CompilerParams(dimension_semantics=("parallel",)),
    )(xp, g.reshape(1, D), b.reshape(1, D))
    return out[:M] if Mp > M else out


def _linear_add_ln_kernel(a_ref, w_ref, b_ref, r_ref, g_ref, beta_ref, o_ref):
    # y = a @ w + b ; out = LayerNorm(residual + y)
    y = jnp.dot(a_ref[...].astype(MATMUL_DTYPE), w_ref[...].astype(MATMUL_DTYPE),
                preferred_element_type=jnp.float32) + b_ref[...]
    x = r_ref[...] + y
    o_ref[...] = _layernorm_math(x, g_ref[...], beta_ref[...]).astype(o_ref.dtype)


def linear_add_layernorm(a2d, w, b, res2d, g, beta):
    """LayerNorm(res + a @ w + b); K = N = d_model, tiled over M only."""
    M, K = a2d.shape
    N = w.shape[1]
    tm, Mp = _tile_and_pad_dim(M, 256, 8)
    ap = _pad_rows(a2d, Mp)
    rp = _pad_rows(res2d, Mp)
    out = pl.pallas_call(
        _linear_add_ln_kernel,
        out_shape=jax.ShapeDtypeStruct((Mp, N), jnp.float32),
        grid=(Mp // tm,),
        in_specs=[
            pl.BlockSpec((tm, K), lambda i: (i, 0)),
            pl.BlockSpec((K, N), lambda i: (0, 0)),
            pl.BlockSpec((1, N), lambda i: (0, 0)),
            pl.BlockSpec((tm, N), lambda i: (i, 0)),
            pl.BlockSpec((1, N), lambda i: (0, 0)),
            pl.BlockSpec((1, N), lambda i: (0, 0)),
        ],
        out_specs=pl.BlockSpec((tm, N), lambda i: (i, 0)),
        compiler_params=pltpu.CompilerParams(
            dimension_semantics=("parallel",),
            vmem_limit_bytes=_VMEM_LIMIT),
    )(ap, w, b.reshape(1, N), rp, g.reshape(1, N), beta.reshape(1, N))
    return out[:M] if Mp > M else out


def _ffn_add_ln_kernel(x_ref, w1_ref, b1_ref, w2_ref, b2_ref, g_ref, beta_ref, o_ref):
    # out = LayerNorm(x + relu(x @ w1 + b1) @ w2 + b2); hidden stays in VMEM.
    x = x_ref[...]
    h = jnp.dot(x.astype(MATMUL_DTYPE), w1_ref[...].astype(MATMUL_DTYPE),
                preferred_element_type=jnp.float32) + b1_ref[...]
    h = jnp.maximum(h, 0.0)
    y = jnp.dot(h.astype(MATMUL_DTYPE), w2_ref[...].astype(MATMUL_DTYPE),
                preferred_element_type=jnp.float32) + b2_ref[...]
    z = x + y
    o_ref[...] = _layernorm_math(z, g_ref[...], beta_ref[...]).astype(o_ref.dtype)


def ffn_add_layernorm(x2d, w1, b1, w2, b2, g, beta):
    M, D = x2d.shape
    F = w1.shape[1]
    tm, Mp = _tile_and_pad_dim(M, 256, 8)
    xp = _pad_rows(x2d, Mp)
    out = pl.pallas_call(
        _ffn_add_ln_kernel,
        out_shape=jax.ShapeDtypeStruct((Mp, D), jnp.float32),
        grid=(Mp // tm,),
        in_specs=[
            pl.BlockSpec((tm, D), lambda i: (i, 0)),
            pl.BlockSpec((D, F), lambda i: (0, 0)),
            pl.BlockSpec((1, F), lambda i: (0, 0)),
            pl.BlockSpec((F, D), lambda i: (0, 0)),
            pl.BlockSpec((1, D), lambda i: (0, 0)),
            pl.BlockSpec((1, D), lambda i: (0, 0)),
            pl.BlockSpec((1, D), lambda i: (0, 0)),
        ],
        out_specs=pl.BlockSpec((tm, D), lambda i: (i, 0)),
        compiler_params=pltpu.CompilerParams(
            dimension_semantics=("parallel",),
            vmem_limit_bytes=_VMEM_LIMIT),
    )(xp, w1, b1.reshape(1, F), w2, b2.reshape(1, D),
      g.reshape(1, D), beta.reshape(1, D))
    return out[:M] if Mp > M else out


def _attention_kernel(q_ref, k_ref, v_ref, o_ref, *, scale):
    # One batch element, all heads per grid step (fatter steps, fewer launches).
    q = q_ref[0].astype(MATMUL_DTYPE)   # (H, Sq, Dh)
    k = k_ref[0].astype(MATMUL_DTYPE)   # (H, Sk, Dh)
    v = v_ref[0].astype(MATMUL_DTYPE)   # (H, Sk, Dh)
    # Contraction over the last dims; no k.T materialization.
    s = jnp.einsum('hqd,hkd->hqk', q, k,
                   preferred_element_type=jnp.float32) * scale
    m = jnp.max(s, axis=-1, keepdims=True)
    p = jnp.exp(s - m)
    denom = jnp.sum(p, axis=-1, keepdims=True)
    o = jnp.einsum('hqk,hkd->hqd', p.astype(MATMUL_DTYPE), v,
                   preferred_element_type=jnp.float32)
    o = o * pl.reciprocal(denom, approx=True)   # EUP slot; ~free next to MXU/exp
    o_ref[0] = o.astype(o_ref.dtype)


def attention(q, k, v):
    """q: (B, H, Sq, Dh), k/v: (B, H, Sk, Dh) -> (B, H, Sq, Dh). Grid over B."""
    B, H, Sq, Dh = q.shape
    Sk = k.shape[2]
    scale = 1.0 / math.sqrt(Dh)
    kernel = functools.partial(_attention_kernel, scale=scale)
    return pl.pallas_call(
        kernel,
        out_shape=jax.ShapeDtypeStruct((B, H, Sq, Dh), jnp.float32),
        grid=(B,),
        in_specs=[
            pl.BlockSpec((1, H, Sq, Dh), lambda b: (b, 0, 0, 0)),
            pl.BlockSpec((1, H, Sk, Dh), lambda b: (b, 0, 0, 0)),
            pl.BlockSpec((1, H, Sk, Dh), lambda b: (b, 0, 0, 0)),
        ],
        out_specs=pl.BlockSpec((1, H, Sq, Dh), lambda b: (b, 0, 0, 0)),
        compiler_params=pltpu.CompilerParams(dimension_semantics=("parallel",)),
    )(q, k, v)


# --------------------------- model building blocks ---------------------------

def mha_core(q_in, kv_in, p, num_heads):
    """Projections + scaled-dot-product attention; returns concatenated heads
    as (B*Sq, D). The output projection is fused with residual+LN by callers."""
    B, Sq, D = q_in.shape
    Sk = kv_in.shape[1]
    Dh = D // num_heads

    if "wqkv" in p:   # self-attention: fused QKV projection (one matmul)
        qkv = linear(q_in.reshape(B * Sq, D), p["wqkv"], p["bqkv"])
        q2, k2, v2 = qkv[:, :D], qkv[:, D:2 * D], qkv[:, 2 * D:]
    else:             # cross-attention: Q from decoder, fused K/V from memory
        q2 = linear(q_in.reshape(B * Sq, D), p["wq"], p["bq"])
        kv = linear(kv_in.reshape(B * Sk, D), p["wkv"], p["bkv"])
        k2, v2 = kv[:, :D], kv[:, D:]

    q = q2.reshape(B, Sq, num_heads, Dh).transpose(0, 2, 1, 3)
    k = k2.reshape(B, Sk, num_heads, Dh).transpose(0, 2, 1, 3)
    v = v2.reshape(B, Sk, num_heads, Dh).transpose(0, 2, 1, 3)
    o = attention(q, k, v)                                   # (B, H, Sq, Dh)
    return o.transpose(0, 2, 1, 3).reshape(B * Sq, D)


def encoder_layer(x, p, num_heads):
    B, S, D = x.shape
    x2 = x.reshape(B * S, D)
    a2 = mha_core(x, x, p["self_attn"], num_heads)
    x2 = linear_add_layernorm(a2, p["self_attn"]["wo"], p["self_attn"]["bo"],
                              x2, p["ln1_g"], p["ln1_b"])
    x2 = ffn_add_layernorm(x2, p["w1"], p["b1"], p["w2"], p["b2"],
                           p["ln2_g"], p["ln2_b"])
    return x2.reshape(B, S, D)


def decoder_layer(y, mem, p, num_heads):
    B, S, D = y.shape
    y2 = y.reshape(B * S, D)
    a2 = mha_core(y, y, p["self_attn"], num_heads)   # no tgt mask (matches torch forward)
    y2 = linear_add_layernorm(a2, p["self_attn"]["wo"], p["self_attn"]["bo"],
                              y2, p["ln1_g"], p["ln1_b"])
    c2 = mha_core(y2.reshape(B, S, D), mem, p["cross_attn"], num_heads)
    y2 = linear_add_layernorm(c2, p["cross_attn"]["wo"], p["cross_attn"]["bo"],
                              y2, p["ln2_g"], p["ln2_b"])
    y2 = ffn_add_layernorm(y2, p["w1"], p["b1"], p["w2"], p["b2"],
                           p["ln3_g"], p["ln3_b"])
    return y2.reshape(B, S, D)


def transformer_forward(params, src_tokens, tgt_tokens, *, num_heads):
    emb = params["embedding"]          # (vocab, D)
    pos = params["pos"]                # (1, max_pos, D)
    B, Ss = src_tokens.shape
    St = tgt_tokens.shape[1]
    D = emb.shape[1]

    # TODO(synk): embedding gather + positional add kept as XLA glue.
    src = emb[src_tokens] + pos[:, :Ss]        # (B, Ss, D)
    tgt = emb[tgt_tokens] + pos[:, :St]        # (B, St, D)

    x = src
    for p in params["encoder_layers"]:
        x = encoder_layer(x, p, num_heads)
    mem = layernorm(x.reshape(B * Ss, D),
                    params["enc_norm_g"], params["enc_norm_b"]).reshape(B, Ss, D)

    y = tgt
    for p in params["decoder_layers"]:
        y = decoder_layer(y, mem, p, num_heads)
    y2 = layernorm(y.reshape(B * St, D), params["dec_norm_g"], params["dec_norm_b"])

    out = linear(y2, params["fc_w"], params["fc_b"])
    return out.reshape(B, St, -1)


# -------------------------------- param init ---------------------------------

def init_params(key, vocab, d_model, ffn_dim, num_enc_layers, num_dec_layers,
                output_dim, max_pos):
    keys = [key]

    def nxt():
        keys[0], sub = jax.random.split(keys[0])
        return sub

    def dense(k_in, k_out):
        w = jax.random.normal(nxt(), (k_in, k_out), jnp.float32) * 0.02
        b = jnp.zeros((k_out,), jnp.float32)
        return w, b

    def self_attn_block():
        wqkv, bqkv = dense(d_model, 3 * d_model)   # fused Q|K|V projection
        wo, bo = dense(d_model, d_model)
        return dict(wqkv=wqkv, bqkv=bqkv, wo=wo, bo=bo)

    def cross_attn_block():
        wq, bq = dense(d_model, d_model)
        wkv, bkv = dense(d_model, 2 * d_model)     # fused K|V projection
        wo, bo = dense(d_model, d_model)
        return dict(wq=wq, bq=bq, wkv=wkv, bkv=bkv, wo=wo, bo=bo)

    def enc_layer():
        w1, b1 = dense(d_model, ffn_dim)
        w2, b2 = dense(ffn_dim, d_model)
        return dict(self_attn=self_attn_block(),
                    w1=w1, b1=b1, w2=w2, b2=b2,
                    ln1_g=jnp.ones((d_model,), jnp.float32),
                    ln1_b=jnp.zeros((d_model,), jnp.float32),
                    ln2_g=jnp.ones((d_model,), jnp.float32),
                    ln2_b=jnp.zeros((d_model,), jnp.float32))

    def dec_layer():
        w1, b1 = dense(d_model, ffn_dim)
        w2, b2 = dense(ffn_dim, d_model)
        return dict(self_attn=self_attn_block(), cross_attn=cross_attn_block(),
                    w1=w1, b1=b1, w2=w2, b2=b2,
                    ln1_g=jnp.ones((d_model,), jnp.float32),
                    ln1_b=jnp.zeros((d_model,), jnp.float32),
                    ln2_g=jnp.ones((d_model,), jnp.float32),
                    ln2_b=jnp.zeros((d_model,), jnp.float32),
                    ln3_g=jnp.ones((d_model,), jnp.float32),
                    ln3_b=jnp.zeros((d_model,), jnp.float32))

    fc_w, fc_b = dense(d_model, output_dim)
    return dict(
        embedding=jax.random.normal(nxt(), (vocab, d_model), jnp.float32) * 0.02,
        pos=jax.random.normal(nxt(), (1, max_pos, d_model), jnp.float32) * 0.02,
        encoder_layers=[enc_layer() for _ in range(num_enc_layers)],
        decoder_layers=[dec_layer() for _ in range(num_dec_layers)],
        enc_norm_g=jnp.ones((d_model,), jnp.float32),
        enc_norm_b=jnp.zeros((d_model,), jnp.float32),
        dec_norm_g=jnp.ones((d_model,), jnp.float32),
        dec_norm_b=jnp.zeros((d_model,), jnp.float32),
        fc_w=fc_w, fc_b=fc_b,
    )


# ----------------------------------- main -------------------------------------

if __name__ == "__main__":
    # Scaled-down shapes consistent with the module's forward
    # (original: vocab=10000, d_model=512, heads=8, layers=6, batch=10, seq=32).
    VOCAB = 100
    D_MODEL = 32
    NUM_HEADS = 4
    FFN_DIM = 64
    NUM_LAYERS = 2
    OUTPUT_DIM = 100
    MAX_POS = 64
    BATCH = 2
    SRC_SEQ = 8
    TGT_SEQ = 8

    root = jax.random.PRNGKey(0)
    k_params, k_src, k_tgt = jax.random.split(root, 3)

    params = init_params(k_params, VOCAB, D_MODEL, FFN_DIM,
                         NUM_LAYERS, NUM_LAYERS, OUTPUT_DIM, MAX_POS)

    src = jax.random.randint(k_src, (BATCH, SRC_SEQ), 0, VOCAB, dtype=jnp.int32)
    tgt = jax.random.randint(k_tgt, (BATCH, TGT_SEQ), 0, VOCAB, dtype=jnp.int32)

    fwd = jax.jit(functools.partial(transformer_forward, num_heads=NUM_HEADS))
    out = fwd(params, src, tgt)
    out = jax.block_until_ready(out)

    assert out.shape == (BATCH, TGT_SEQ, OUTPUT_DIM), out.shape
    assert bool(jnp.all(jnp.isfinite(out)))
    print("KERNEL_OK")
</pallas_src>

<mosaic_0001>
module attributes {stable_mosaic.version = 11 : i64} {
  func.func @_linear_kernel(%arg0: i32, %arg1: i32, %arg2: i32, %arg3: memref<16x32xf32, #tpu.memory_space<vmem>>, %arg4: memref<32x96xf32, #tpu.memory_space<vmem>>, %arg5: memref<1x96xf32, #tpu.memory_space<vmem>>, %arg6: memref<16x96xf32, #tpu.memory_space<vmem>>, %arg7: memref<16x96xf32, #tpu.memory_space<vmem>>) attributes {dimension_semantics = [#tpu.dimension_semantics<parallel>, #tpu.dimension_semantics<parallel>, #tpu.dimension_semantics<arbitrary>], iteration_bounds = array<i64: 1, 1, 1>, scalar_prefetch = 0 : i64, scratch_operands = 1 : i64, tpu.core_type = #tpu.core_type<tc>, window_params = [{transform_indices = @transform_0, window_bounds = array<i64: 16, 32>}, {transform_indices = @transform_1, window_bounds = array<i64: 32, 96>}, {transform_indices = @transform_2, window_bounds = array<i64: 1, 96>}, {transform_indices = @transform_3, window_bounds = array<i64: 16, 96>}]} {
    %c0_i32 = arith.constant 0 : i32
    %0 = arith.cmpi eq, %arg2, %c0_i32 : i32
    %1 = arith.extui %0 : i1 to i32
    %c0_i32_0 = arith.constant 0 : i32
    %2 = arith.cmpi ne, %1, %c0_i32_0 : i32
    scf.if %2 {
      %cst_10 = arith.constant 0.000000e+00 : f32
      %12 = vector.broadcast %cst_10 : f32 to vector<16x96xf32>
      %c0_11 = arith.constant 0 : index
      %c0_12 = arith.constant 0 : index
      %13 = vector.load %arg7[%c0_11, %c0_12] : memref<16x96xf32, #tpu.memory_space<vmem>>, vector<16x96xf32>
      tpu.vector_store %arg7[%c0_11, %c0_12], %12 {strides = array<i32>} : memref<16x96xf32, #tpu.memory_space<vmem>>, vector<16x96xf32>,
    } else {
    }
    %c0 = arith.constant 0 : index
    %c0_1 = arith.constant 0 : index
    %3 = vector.load %arg3[%c0, %c0_1] : memref<16x32xf32, #tpu.memory_space<vmem>>, vector<16x32xf32>
    %c0_2 = arith.constant 0 : index
    %c0_3 = arith.constant 0 : index
    %4 = vector.load %arg4[%c0_2, %c0_3] : memref<32x96xf32, #tpu.memory_space<vmem>>, vector<32x96xf32>
    %c0_4 = arith.constant 0 : index
    %c0_5 = arith.constant 0 : index
    %5 = vector.load %arg7[%c0_4, %c0_5] : memref<16x96xf32, #tpu.memory_space<vmem>>, vector<16x96xf32>
    %cst = arith.constant dense<0.000000e+00> : vector<16x96xf32>
    %6 = tpu.matmul %3, %4, %cst {dimension_numbers = #tpu.dot_dimension_numbers<[1], [0], [0], [1], [0, 0, 1, 1], [], []>} : vector<16x32xf32>, vector<32x96xf32>, vector<16x96xf32> -> vector<16x96xf32>
    %7 = arith.addf %5, %6 : vector<16x96xf32>
    %c0_6 = arith.constant 0 : index
    %c0_7 = arith.constant 0 : index
    %8 = vector.load %arg7[%c0_6, %c0_7] : memref<16x96xf32, #tpu.memory_space<vmem>>, vector<16x96xf32>
    tpu.vector_store %arg7[%c0_6, %c0_7], %7 {strides = array<i32>} : memref<16x96xf32, #tpu.memory_space<vmem>>, vector<16x96xf32>,
    %c0_i32_8 = arith.constant 0 : i32
    %9 = arith.cmpi eq, %arg2, %c0_i32_8 : i32
    %10 = arith.extui %9 : i1 to i32
    %c0_i32_9 = arith.constant 0 : i32
    %11 = arith.cmpi ne, %10, %c0_i32_9 : i32
    scf.if %11 {
      %c0_10 = arith.constant 0 : index
      %c0_11 = arith.constant 0 : index
      %12 = vector.load %arg7[%c0_10, %c0_11] : memref<16x96xf32, #tpu.memory_space<vmem>>, vector<16x96xf32>
      %c0_12 = arith.constant 0 : index
      %c0_13 = arith.constant 0 : index
      %13 = vector.load %arg5[%c0_12, %c0_13] : memref<1x96xf32, #tpu.memory_space<vmem>>, vector<1x96xf32>
      %14 = vector.broadcast %13 : vector<1x96xf32> to vector<16x96xf32>
      %15 = arith.addf %12, %14 : vector<16x96xf32>
      %c0_14 = arith.constant 0 : index
      %c0_15 = arith.constant 0 : index
      %16 = vector.load %arg6[%c0_14, %c0_15] : memref<16x96xf32, #tpu.memory_space<vmem>>, vector<16x96xf32>
      tpu.vector_store %arg6[%c0_14, %c0_15], %15 {strides = array<i32>} : memref<16x96xf32, #tpu.memory_space<vmem>>, vector<16x96xf32>,
    } else {
    }
    return
  }
  func.func @transform_0(%arg0: i32, %arg1: i32, %arg2: i32) -> (i32, i32) {
    %c0_i32 = arith.constant 0 : i32
    return %arg0, %arg2 : i32, i32
  }
  func.func @transform_1(%arg0: i32, %arg1: i32, %arg2: i32) -> (i32, i32) {
    %c0_i32 = arith.constant 0 : i32
    return %arg2, %arg1 : i32, i32
  }
  func.func @transform_2(%arg0: i32, %arg1: i32, %arg2: i32) -> (i32, i32) {
    %c0_i32 = arith.constant 0 : i32
    %c0_i32_0 = arith.constant 0 : i32
    return %c0_i32, %arg1 : i32, i32
  }
  func.func @transform_3(%arg0: i32, %arg1: i32, %arg2: i32) -> (i32, i32) {
    %c0_i32 = arith.constant 0 : i32
    return %arg0, %arg1 : i32, i32
  }
}

module attributes {stable_mosaic.version = 11 : i64} {
  func.func @_attention_kernel(%arg0: i32, %arg1: memref<1x4x8x8xf32, #tpu.memory_space<vmem>>, %arg2: memref<1x4x8x8xf32, #tpu.memory_space<vmem>>, %arg3: memref<1x4x8x8xf32, #tpu.memory_space<vmem>>, %arg4: memref<1x4x8x8xf32, #tpu.memory_space<vmem>>) attributes {dimension_semantics = [#tpu.dimension_semantics<parallel>], iteration_bounds = array<i64: 2>, scalar_prefetch = 0 : i64, scratch_operands = 0 : i64, tpu.core_type = #tpu.core_type<tc>, window_params = [{transform_indices = @transform_0, window_bounds = array<i64: 1, 4, 8, 8>}, {transform_indices = @transform_1, window_bounds = array<i64: 1, 4, 8, 8>}, {transform_indices = @transform_2, window_bounds = array<i64: 1, 4, 8, 8>}, {transform_indices = @transform_3, window_bounds = array<i64: 1, 4, 8, 8>}]} {
    %c0 = arith.constant 0 : index
    %c0_0 = arith.constant 0 : index
    %c0_1 = arith.constant 0 : index
    %c0_2 = arith.constant 0 : index
    %0 = vector.load %arg1[%c0, %c0_0, %c0_1, %c0_2] : memref<1x4x8x8xf32, #tpu.memory_space<vmem>>, vector<1x4x8x8xf32>
    %1 = vector.shape_cast %0 : vector<1x4x8x8xf32> to vector<4x8x8xf32>
    %c0_3 = arith.constant 0 : index
    %c0_4 = arith.constant 0 : index
    %c0_5 = arith.constant 0 : index
    %c0_6 = arith.constant 0 : index
    %2 = vector.load %arg2[%c0_3, %c0_4, %c0_5, %c0_6] : memref<1x4x8x8xf32, #tpu.memory_space<vmem>>, vector<1x4x8x8xf32>
    %3 = vector.shape_cast %2 : vector<1x4x8x8xf32> to vector<4x8x8xf32>
    %c0_7 = arith.constant 0 : index
    %c0_8 = arith.constant 0 : index
    %c0_9 = arith.constant 0 : index
    %c0_10 = arith.constant 0 : index
    %4 = vector.load %arg3[%c0_7, %c0_8, %c0_9, %c0_10] : memref<1x4x8x8xf32, #tpu.memory_space<vmem>>, vector<1x4x8x8xf32>
    %5 = vector.shape_cast %4 : vector<1x4x8x8xf32> to vector<4x8x8xf32>
    "tpu.trace_start"() <{level = 10 : i32, message = "hqd,hkd->hqk"}> : () -> ()
    %cst = arith.constant dense<0.000000e+00> : vector<4x8x8xf32>
    %6 = tpu.matmul %1, %3, %cst {dimension_numbers = #tpu.dot_dimension_numbers<[2], [2], [1], [1], [0, 0, 0, 1, 1, 1], [0], [0]>} : vector<4x8x8xf32>, vector<4x8x8xf32>, vector<4x8x8xf32> -> vector<4x8x8xf32>
    "tpu.trace_stop"() : () -> ()
    %cst_11 = arith.constant 0.353553385 : f32
    %7 = vector.broadcast %cst_11 : f32 to vector<4x8x8xf32>
    %8 = arith.mulf %6, %7 : vector<4x8x8xf32>
    %cst_12 = arith.constant dense<0xFF800000> : vector<4x8xf32>
    %9 = vector.multi_reduction <maximumf>, %8, %cst_12 [2] : vector<4x8x8xf32> to vector<4x8xf32>
    %10 = vector.shape_cast %9 : vector<4x8xf32> to vector<4x8x1xf32>
    %11 = vector.broadcast %10 : vector<4x8x1xf32> to vector<4x8x8xf32>
    %12 = arith.subf %8, %11 : vector<4x8x8xf32>
    %13 = math.exp %12 : vector<4x8x8xf32>
    %cst_13 = arith.constant dense<0.000000e+00> : vector<4x8xf32>
    %14 = vector.multi_reduction <add>, %13, %cst_13 [2] : vector<4x8x8xf32> to vector<4x8xf32>
    %15 = vector.shape_cast %14 : vector<4x8xf32> to vector<4x8x1xf32>
    "tpu.trace_start"() <{level = 10 : i32, message = "hqk,hkd->hqd"}> : () -> ()
    %cst_14 = arith.constant dense<0.000000e+00> : vector<4x8x8xf32>
    %16 = tpu.matmul %13, %5, %cst_14 {dimension_numbers = #tpu.dot_dimension_numbers<[2], [1], [1], [2], [0, 0, 0, 1, 1, 2], [0], [0]>} : vector<4x8x8xf32>, vector<4x8x8xf32>, vector<4x8x8xf32> -> vector<4x8x8xf32>
    "tpu.trace_stop"() : () -> ()
    %17 = tpu.reciprocal %15 {approx = true} : vector<4x8x1xf32> -> vector<4x8x1xf32>
    %18 = vector.broadcast %17 : vector<4x8x1xf32> to vector<4x8x8xf32>
    %19 = arith.mulf %16, %18 : vector<4x8x8xf32>
    %c0_15 = arith.constant 0 : index
    %c0_16 = arith.constant 0 : index
    %c0_17 = arith.constant 0 : index
    %c0_18 = arith.constant 0 : index
    %20 = vector.load %arg4[%c0_15, %c0_16, %c0_17, %c0_18] : memref<1x4x8x8xf32, #tpu.memory_space<vmem>>, vector<1x4x8x8xf32>
    %21 = vector.shape_cast %20 : vector<1x4x8x8xf32> to vector<4x8x8xf32>
    %22 = vector.shape_cast %19 : vector<4x8x8xf32> to vector<1x4x8x8xf32>
    tpu.vector_store %arg4[%c0_15, %c0_16, %c0_17, %c0_18], %22 {strides = array<i32>} : memref<1x4x8x8xf32, #tpu.memory_space<vmem>>, vector<1x4x8x8xf32>,
    return
  }
  func.func @transform_0(%arg0: i32) -> (i32, i32, i32, i32) {
    %c0_i32 = arith.constant 0 : i32
    %c0_i32_0 = arith.constant 0 : i32
    %c0_i32_1 = arith.constant 0 : i32
    %c0_i32_2 = arith.constant 0 : i32
    return %arg0, %c0_i32, %c0_i32_0, %c0_i32_1 : i32, i32, i32, i32
  }
  func.func @transform_1(%arg0: i32) -> (i32, i32, i32, i32) {
    %c0_i32 = arith.constant 0 : i32
    %c0_i32_0 = arith.constant 0 : i32
    %c0_i32_1 = arith.constant 0 : i32
    %c0_i32_2 = arith.constant 0 : i32
    return %arg0, %c0_i32, %c0_i32_0, %c0_i32_1 : i32, i32, i32, i32
  }
  func.func @transform_2(%arg0: i32) -> (i32, i32, i32, i32) {
    %c0_i32 = arith.constant 0 : i32
    %c0_i32_0 = arith.constant 0 : i32
    %c0_i32_1 = arith.constant 0 : i32
    %c0_i32_2 = arith.constant 0 : i32
    return %arg0, %c0_i32, %c0_i32_0, %c0_i32_1 : i32, i32, i32, i32
  }
  func.func @transform_3(%arg0: i32) -> (i32, i32, i32, i32) {
    %c0_i32 = arith.constant 0 : i32
    %c0_i32_0 = arith.constant 0 : i32
    %c0_i32_1 = arith.constant 0 : i32
    %c0_i32_2 = arith.constant 0 : i32
    return %arg0, %c0_i32, %c0_i32_0, %c0_i32_1 : i32, i32, i32, i32
  }
}

module attributes {stable_mosaic.version = 11 : i64} {
  func.func @_linear_add_ln_kernel(%arg0: i32, %arg1: memref<16x32xf32, #tpu.memory_space<vmem>>, %arg2: memref<32x32xf32, #tpu.memory_space<vmem>>, %arg3: memref<1x32xf32, #tpu.memory_space<vmem>>, %arg4: memref<16x32xf32, #tpu.memory_space<vmem>>, %arg5: memref<1x32xf32, #tpu.memory_space<vmem>>, %arg6: memref<1x32xf32, #tpu.memory_space<vmem>>, %arg7: memref<16x32xf32, #tpu.memory_space<vmem>>) attributes {dimension_semantics = [#tpu.dimension_semantics<parallel>], iteration_bounds = array<i64: 1>, scalar_prefetch = 0 : i64, scratch_operands = 0 : i64, tpu.core_type = #tpu.core_type<tc>, window_params = [{transform_indices = @transform_0, window_bounds = array<i64: 16, 32>}, {pipeline_mode = #tpu.pipeline_mode<synchronous>, transform_indices = @transform_1, window_bounds = array<i64: 32, 32>}, {pipeline_mode = #tpu.pipeline_mode<synchronous>, transform_indices = @transform_2, window_bounds = array<i64: 1, 32>}, {transform_indices = @transform_3, window_bounds = array<i64: 16, 32>}, {pipeline_mode = #tpu.pipeline_mode<synchronous>, transform_indices = @transform_4, window_bounds = array<i64: 1, 32>}, {pipeline_mode = #tpu.pipeline_mode<synchronous>, transform_indices = @transform_5, window_bounds = array<i64: 1, 32>}, {transform_indices = @transform_6, window_bounds = array<i64: 16, 32>}]} {
    %c0 = arith.constant 0 : index
    %c0_0 = arith.constant 0 : index
    %0 = vector.load %arg1[%c0, %c0_0] : memref<16x32xf32, #tpu.memory_space<vmem>>, vector<16x32xf32>
    %c0_1 = arith.constant 0 : index
    %c0_2 = arith.constant 0 : index
    %1 = vector.load %arg2[%c0_1, %c0_2] : memref<32x32xf32, #tpu.memory_space<vmem>>, vector<32x32xf32>
    %cst = arith.constant dense<0.000000e+00> : vector<16x32xf32>
    %2 = tpu.matmul %0, %1, %cst {dimension_numbers = #tpu.dot_dimension_numbers<[1], [0], [0], [1], [0, 0, 1, 1], [], []>} : vector<16x32xf32>, vector<32x32xf32>, vector<16x32xf32> -> vector<16x32xf32>
    %c0_3 = arith.constant 0 : index
    %c0_4 = arith.constant 0 : index
    %3 = vector.load %arg3[%c0_3, %c0_4] : memref<1x32xf32, #tpu.memory_space<vmem>>, vector<1x32xf32>
    %4 = vector.broadcast %3 : vector<1x32xf32> to vector<16x32xf32>
    %5 = arith.addf %2, %4 : vector<16x32xf32>
    %c0_5 = arith.constant 0 : index
    %c0_6 = arith.constant 0 : index
    %6 = vector.load %arg4[%c0_5, %c0_6] : memref<16x32xf32, #tpu.memory_space<vmem>>, vector<16x32xf32>
    %7 = arith.addf %6, %5 : vector<16x32xf32>
    %c0_7 = arith.constant 0 : index
    %c0_8 = arith.constant 0 : index
    %8 = vector.load %arg5[%c0_7, %c0_8] : memref<1x32xf32, #tpu.memory_space<vmem>>, vector<1x32xf32>
    %c0_9 = arith.constant 0 : index
    %c0_10 = arith.constant 0 : index
    %9 = vector.load %arg6[%c0_9, %c0_10] : memref<1x32xf32, #tpu.memory_space<vmem>>, vector<1x32xf32>
    %cst_11 = arith.constant dense<0.000000e+00> : vector<16xf32>
    %10 = vector.multi_reduction <add>, %7, %cst_11 [1] : vector<16x32xf32> to vector<16xf32>
    %11 = vector.shape_cast %10 : vector<16xf32> to vector<16x1xf32>
    %cst_12 = arith.constant 3.200000e+01 : f32
    %12 = vector.broadcast %cst_12 : f32 to vector<16x1xf32>
    %13 = arith.divf %11, %12 : vector<16x1xf32>
    %14 = vector.broadcast %13 : vector<16x1xf32> to vector<16x32xf32>
    %15 = arith.subf %7, %14 : vector<16x32xf32>
    %16 = arith.mulf %15, %15 : vector<16x32xf32>
    %cst_13 = arith.constant dense<0.000000e+00> : vector<16xf32>
    %17 = vector.multi_reduction <add>, %16, %cst_13 [1] : vector<16x32xf32> to vector<16xf32>
    %18 = vector.shape_cast %17 : vector<16xf32> to vector<16x1xf32>
    %cst_14 = arith.constant 3.200000e+01 : f32
    %19 = vector.broadcast %cst_14 : f32 to vector<16x1xf32>
    %20 = arith.divf %18, %19 : vector<16x1xf32>
    %21 = vector.broadcast %13 : vector<16x1xf32> to vector<16x32xf32>
    %22 = arith.subf %7, %21 : vector<16x32xf32>
    %cst_15 = arith.constant 9.99999974E-6 : f32
    %23 = vector.broadcast %cst_15 : f32 to vector<16x1xf32>
    %24 = arith.addf %20, %23 : vector<16x1xf32>
    %25 = math.rsqrt %24 : vector<16x1xf32>
    %26 = vector.broadcast %25 : vector<16x1xf32> to vector<16x32xf32>
    %27 = arith.mulf %22, %26 : vector<16x32xf32>
    %28 = vector.broadcast %8 : vector<1x32xf32> to vector<16x32xf32>
    %29 = arith.mulf %27, %28 : vector<16x32xf32>
    %30 = vector.broadcast %9 : vector<1x32xf32> to vector<16x32xf32>
    %31 = arith.addf %29, %30 : vector<16x32xf32>
    %c0_16 = arith.constant 0 : index
    %c0_17 = arith.constant 0 : index
    %32 = vector.load %arg7[%c0_16, %c0_17] : memref<16x32xf32, #tpu.memory_space<vmem>>, vector<16x32xf32>
    tpu.vector_store %arg7[%c0_16, %c0_17], %31 {strides = array<i32>} : memref<16x32xf32, #tpu.memory_space<vmem>>, vector<16x32xf32>,
    return
  }
  func.func @transform_0(%arg0: i32) -> (i32, i32) {
    %c0_i32 = arith.constant 0 : i32
    %c0_i32_0 = arith.constant 0 : i32
    return %arg0, %c0_i32 : i32, i32
  }
  func.func @transform_1(%arg0: i32) -> (i32, i32) {
    %c0_i32 = arith.constant 0 : i32
    %c0_i32_0 = arith.constant 0 : i32
    %c0_i32_1 = arith.constant 0 : i32
    return %c0_i32, %c0_i32_0 : i32, i32
  }
  func.func @transform_2(%arg0: i32) -> (i32, i32) {
    %c0_i32 = arith.constant 0 : i32
    %c0_i32_0 = arith.constant 0 : i32
    %c0_i32_1 = arith.constant 0 : i32
    return %c0_i32, %c0_i32_0 : i32, i32
  }
  func.func @transform_3(%arg0: i32) -> (i32, i32) {
    %c0_i32 = arith.constant 0 : i32
    %c0_i32_0 = arith.constant 0 : i32
    return %arg0, %c0_i32 : i32, i32
  }
  func.func @transform_4(%arg0: i32) -> (i32, i32) {
    %c0_i32 = arith.constant 0 : i32
    %c0_i32_0 = arith.constant 0 : i32
    %c0_i32_1 = arith.constant 0 : i32
    return %c0_i32, %c0_i32_0 : i32, i32
  }
  func.func @transform_5(%arg0: i32) -> (i32, i32) {
    %c0_i32 = arith.constant 0 : i32
    %c0_i32_0 = arith.constant 0 : i32
    %c0_i32_1 = arith.constant 0 : i32
    return %c0_i32, %c0_i32_0 : i32, i32
  }
  func.func @transform_6(%arg0: i32) -> (i32, i32) {
    %c0_i32 = arith.constant 0 : i32
    %c0_i32_0 = arith.constant 0 : i32
    return %arg0, %c0_i32 : i32, i32
  }
}

module attributes {stable_mosaic.version = 11 : i64} {
  func.func @_linear_kernel(%arg0: i32, %arg1: i32, %arg2: i32, %arg3: memref<16x32xf32, #tpu.memory_space<vmem>>, %arg4: memref<32x32xf32, #tpu.memory_space<vmem>>, %arg5: memref<1x32xf32, #tpu.memory_space<vmem>>, %arg6: memref<16x32xf32, #tpu.memory_space<vmem>>, %arg7: memref<16x32xf32, #tpu.memory_space<vmem>>) attributes {dimension_semantics = [#tpu.dimension_semantics<parallel>, #tpu.dimension_semantics<parallel>, #tpu.dimension_semantics<arbitrary>], iteration_bounds = array<i64: 1, 1, 1>, scalar_prefetch = 0 : i64, scratch_operands = 1 : i64, tpu.core_type = #tpu.core_type<tc>, window_params = [{transform_indices = @transform_0, window_bounds = array<i64: 16, 32>}, {transform_indices = @transform_1, window_bounds = array<i64: 32, 32>}, {transform_indices = @transform_2, window_bounds = array<i64: 1, 32>}, {transform_indices = @transform_3, window_bounds = array<i64: 16, 32>}]} {
    %c0_i32 = arith.constant 0 : i32
    %0 = arith.cmpi eq, %arg2, %c0_i32 : i32
    %1 = arith.extui %0 : i1 to i32
    %c0_i32_0 = arith.constant 0 : i32
    %2 = arith.cmpi ne, %1, %c0_i32_0 : i32
    scf.if %2 {
      %cst_10 = arith.constant 0.000000e+00 : f32
      %12 = vector.broadcast %cst_10 : f32 to vector<16x32xf32>
      %c0_11 = arith.constant 0 : index
      %c0_12 = arith.constant 0 : index
      %13 = vector.load %arg7[%c0_11, %c0_12] : memref<16x32xf32, #tpu.memory_space<vmem>>, vector<16x32xf32>
      tpu.vector_store %arg7[%c0_11, %c0_12], %12 {strides = array<i32>} : memref<16x32xf32, #tpu.memory_space<vmem>>, vector<16x32xf32>,
    } else {
    }
    %c0 = arith.constant 0 : index
    %c0_1 = arith.constant 0 : index
    %3 = vector.load %arg3[%c0, %c0_1] : memref<16x32xf32, #tpu.memory_space<vmem>>, vector<16x32xf32>
    %c0_2 = arith.constant 0 : index
    %c0_3 = arith.constant 0 : index
    %4 = vector.load %arg4[%c0_2, %c0_3] : memref<32x32xf32, #tpu.memory_space<vmem>>, vector<32x32xf32>
    %c0_4 = arith.constant 0 : index
    %c0_5 = arith.constant 0 : index
    %5 = vector.load %arg7[%c0_4, %c0_5] : memref<16x32xf32, #tpu.memory_space<vmem>>, vector<16x32xf32>
    %cst = arith.constant dense<0.000000e+00> : vector<16x32xf32>
    %6 = tpu.matmul %3, %4, %cst {dimension_numbers = #tpu.dot_dimension_numbers<[1], [0], [0], [1], [0, 0, 1, 1], [], []>} : vector<16x32xf32>, vector<32x32xf32>, vector<16x32xf32> -> vector<16x32xf32>
    %7 = arith.addf %5, %6 : vector<16x32xf32>
    %c0_6 = arith.constant 0 : index
    %c0_7 = arith.constant 0 : index
    %8 = vector.load %arg7[%c0_6, %c0_7] : memref<16x32xf32, #tpu.memory_space<vmem>>, vector<16x32xf32>
    tpu.vector_store %arg7[%c0_6, %c0_7], %7 {strides = array<i32>} : memref<16x32xf32, #tpu.memory_space<vmem>>, vector<16x32xf32>,
    %c0_i32_8 = arith.constant 0 : i32
    %9 = arith.cmpi eq, %arg2, %c0_i32_8 : i32
    %10 = arith.extui %9 : i1 to i32
    %c0_i32_9 = arith.constant 0 : i32
    %11 = arith.cmpi ne, %10, %c0_i32_9 : i32
    scf.if %11 {
      %c0_10 = arith.constant 0 : index
      %c0_11 = arith.constant 0 : index
      %12 = vector.load %arg7[%c0_10, %c0_11] : memref<16x32xf32, #tpu.memory_space<vmem>>, vector<16x32xf32>
      %c0_12 = arith.constant 0 : index
      %c0_13 = arith.constant 0 : index
      %13 = vector.load %arg5[%c0_12, %c0_13] : memref<1x32xf32, #tpu.memory_space<vmem>>, vector<1x32xf32>
      %14 = vector.broadcast %13 : vector<1x32xf32> to vector<16x32xf32>
      %15 = arith.addf %12, %14 : vector<16x32xf32>
      %c0_14 = arith.constant 0 : index
      %c0_15 = arith.constant 0 : index
      %16 = vector.load %arg6[%c0_14, %c0_15] : memref<16x32xf32, #tpu.memory_space<vmem>>, vector<16x32xf32>
      tpu.vector_store %arg6[%c0_14, %c0_15], %15 {strides = array<i32>} : memref<16x32xf32, #tpu.memory_space<vmem>>, vector<16x32xf32>,
    } else {
    }
    return
  }
  func.func @transform_0(%arg0: i32, %arg1: i32, %arg2: i32) -> (i32, i32) {
    %c0_i32 = arith.constant 0 : i32
    return %arg0, %arg2 : i32, i32
  }
  func.func @transform_1(%arg0: i32, %arg1: i32, %arg2: i32) -> (i32, i32) {
    %c0_i32 = arith.constant 0 : i32
    return %arg2, %arg1 : i32, i32
  }
  func.func @transform_2(%arg0: i32, %arg1: i32, %arg2: i32) -> (i32, i32) {
    %c0_i32 = arith.constant 0 : i32
    %c0_i32_0 = arith.constant 0 : i32
    return %c0_i32, %arg1 : i32, i32
  }
  func.func @transform_3(%arg0: i32, %arg1: i32, %arg2: i32) -> (i32, i32) {
    %c0_i32 = arith.constant 0 : i32
    return %arg0, %arg1 : i32, i32
  }
}

module attributes {stable_mosaic.version = 11 : i64} {
  func.func @_ffn_add_ln_kernel(%arg0: i32, %arg1: memref<16x32xf32, #tpu.memory_space<vmem>>, %arg2: memref<32x64xf32, #tpu.memory_space<vmem>>, %arg3: memref<1x64xf32, #tpu.memory_space<vmem>>, %arg4: memref<64x32xf32, #tpu.memory_space<vmem>>, %arg5: memref<1x32xf32, #tpu.memory_space<vmem>>, %arg6: memref<1x32xf32, #tpu.memory_space<vmem>>, %arg7: memref<1x32xf32, #tpu.memory_space<vmem>>, %arg8: memref<16x32xf32, #tpu.memory_space<vmem>>) attributes {dimension_semantics = [#tpu.dimension_semantics<parallel>], iteration_bounds = array<i64: 1>, scalar_prefetch = 0 : i64, scratch_operands = 0 : i64, tpu.core_type = #tpu.core_type<tc>, window_params = [{transform_indices = @transform_0, window_bounds = array<i64: 16, 32>}, {pipeline_mode = #tpu.pipeline_mode<synchronous>, transform_indices = @transform_1, window_bounds = array<i64: 32, 64>}, {pipeline_mode = #tpu.pipeline_mode<synchronous>, transform_indices = @transform_2, window_bounds = array<i64: 1, 64>}, {pipeline_mode = #tpu.pipeline_mode<synchronous>, transform_indices = @transform_3, window_bounds = array<i64: 64, 32>}, {pipeline_mode = #tpu.pipeline_mode<synchronous>, transform_indices = @transform_4, window_bounds = array<i64: 1, 32>}, {pipeline_mode = #tpu.pipeline_mode<synchronous>, transform_indices = @transform_5, window_bounds = array<i64: 1, 32>}, {pipeline_mode = #tpu.pipeline_mode<synchronous>, transform_indices = @transform_6, window_bounds = array<i64: 1, 32>}, {transform_indices = @transform_7, window_bounds = array<i64: 16, 32>}]} {
    %c0 = arith.constant 0 : index
    %c0_0 = arith.constant 0 : index
    %0 = vector.load %arg1[%c0, %c0_0] : memref<16x32xf32, #tpu.memory_space<vmem>>, vector<16x32xf32>
    %c0_1 = arith.constant 0 : index
    %c0_2 = arith.constant 0 : index
    %1 = vector.load %arg2[%c0_1, %c0_2] : memref<32x64xf32, #tpu.memory_space<vmem>>, vector<32x64xf32>
    %cst = arith.constant dense<0.000000e+00> : vector<16x64xf32>
    %2 = tpu.matmul %0, %1, %cst {dimension_numbers = #tpu.dot_dimension_numbers<[1], [0], [0], [1], [0, 0, 1, 1], [], []>} : vector<16x32xf32>, vector<32x64xf32>, vector<16x64xf32> -> vector<16x64xf32>
    %c0_3 = arith.constant 0 : index
    %c0_4 = arith.constant 0 : index
    %3 = vector.load %arg3[%c0_3, %c0_4] : memref<1x64xf32, #tpu.memory_space<vmem>>, vector<1x64xf32>
    %4 = vector.broadcast %3 : vector<1x64xf32> to vector<16x64xf32>
    %5 = arith.addf %2, %4 : vector<16x64xf32>
    %cst_5 = arith.constant 0.000000e+00 : f32
    %6 = vector.broadcast %cst_5 : f32 to vector<16x64xf32>
    %7 = arith.maximumf %5, %6 : vector<16x64xf32>
    %c0_6 = arith.constant 0 : index
    %c0_7 = arith.constant 0 : index
    %8 = vector.load %arg4[%c0_6, %c0_7] : memref<64x32xf32, #tpu.memory_space<vmem>>, vector<64x32xf32>
    %cst_8 = arith.constant dense<0.000000e+00> : vector<16x32xf32>
    %9 = tpu.matmul %7, %8, %cst_8 {dimension_numbers = #tpu.dot_dimension_numbers<[1], [0], [0], [1], [0, 0, 1, 1], [], []>} : vector<16x64xf32>, vector<64x32xf32>, vector<16x32xf32> -> vector<16x32xf32>
    %c0_9 = arith.constant 0 : index
    %c0_10 = arith.constant 0 : index
    %10 = vector.load %arg5[%c0_9, %c0_10] : memref<1x32xf32, #tpu.memory_space<vmem>>, vector<1x32xf32>
    %11 = vector.broadcast %10 : vector<1x32xf32> to vector<16x32xf32>
    %12 = arith.addf %9, %11 : vector<16x32xf32>
    %13 = arith.addf %0, %12 : vector<16x32xf32>
    %c0_11 = arith.constant 0 : index
    %c0_12 = arith.constant 0 : index
    %14 = vector.load %arg6[%c0_11, %c0_12] : memref<1x32xf32, #tpu.memory_space<vmem>>, vector<1x32xf32>
    %c0_13 = arith.constant 0 : index
    %c0_14 = arith.constant 0 : index
    %15 = vector.load %arg7[%c0_13, %c0_14] : memref<1x32xf32, #tpu.memory_space<vmem>>, vector<1x32xf32>
    %cst_15 = arith.constant dense<0.000000e+00> : vector<16xf32>
    %16 = vector.multi_reduction <add>, %13, %cst_15 [1] : vector<16x32xf32> to vector<16xf32>
    %17 = vector.shape_cast %16 : vector<16xf32> to vector<16x1xf32>
    %cst_16 = arith.constant 3.200000e+01 : f32
    %18 = vector.broadcast %cst_16 : f32 to vector<16x1xf32>
    %19 = arith.divf %17, %18 : vector<16x1xf32>
    %20 = vector.broadcast %19 : vector<16x1xf32> to vector<16x32xf32>
    %21 = arith.subf %13, %20 : vector<16x32xf32>
    %22 = arith.mulf %21, %21 : vector<16x32xf32>
    %cst_17 = arith.constant dense<0.000000e+00> : vector<16xf32>
    %23 = vector.multi_reduction <add>, %22, %cst_17 [1] : vector<16x32xf32> to vector<16xf32>
    %24 = vector.shape_cast %23 : vector<16xf32> to vector<16x1xf32>
    %cst_18 = arith.constant 3.200000e+01 : f32
    %25 = vector.broadcast %cst_18 : f32 to vector<16x1xf32>
    %26 = arith.divf %24, %25 : vector<16x1xf32>
    %27 = vector.broadcast %19 : vector<16x1xf32> to vector<16x32xf32>
    %28 = arith.subf %13, %27 : vector<16x32xf32>
    %cst_19 = arith.constant 9.99999974E-6 : f32
    %29 = vector.broadcast %cst_19 : f32 to vector<16x1xf32>
    %30 = arith.addf %26, %29 : vector<16x1xf32>
    %31 = math.rsqrt %30 : vector<16x1xf32>
    %32 = vector.broadcast %31 : vector<16x1xf32> to vector<16x32xf32>
    %33 = arith.mulf %28, %32 : vector<16x32xf32>
    %34 = vector.broadcast %14 : vector<1x32xf32> to vector<16x32xf32>
    %35 = arith.mulf %33, %34 : vector<16x32xf32>
    %36 = vector.broadcast %15 : vector<1x32xf32> to vector<16x32xf32>
    %37 = arith.addf %35, %36 : vector<16x32xf32>
    %c0_20 = arith.constant 0 : index
    %c0_21 = arith.constant 0 : index
    %38 = vector.load %arg8[%c0_20, %c0_21] : memref<16x32xf32, #tpu.memory_space<vmem>>, vector<16x32xf32>
    tpu.vector_store %arg8[%c0_20, %c0_21], %37 {strides = array<i32>} : memref<16x32xf32, #tpu.memory_space<vmem>>, vector<16x32xf32>,
    return
  }
  func.func @transform_0(%arg0: i32) -> (i32, i32) {
    %c0_i32 = arith.constant 0 : i32
    %c0_i32_0 = arith.constant 0 : i32
    return %arg0, %c0_i32 : i32, i32
  }
  func.func @transform_1(%arg0: i32) -> (i32, i32) {
    %c0_i32 = arith.constant 0 : i32
    %c0_i32_0 = arith.constant 0 : i32
    %c0_i32_1 = arith.constant 0 : i32
    return %c0_i32, %c0_i32_0 : i32, i32
  }
  func.func @transform_2(%arg0: i32) -> (i32, i32) {
    %c0_i32 = arith.constant 0 : i32
    %c0_i32_0 = arith.constant 0 : i32
    %c0_i32_1 = arith.constant 0 : i32
    return %c0_i32, %c0_i32_0 : i32, i32
  }
  func.func @transform_3(%arg0: i32) -> (i32, i32) {
    %c0_i32 = arith.constant 0 : i32
    %c0_i32_0 = arith.constant 0 : i32
    %c0_i32_1 = arith.constant 0 : i32
    return %c0_i32, %c0_i32_0 : i32, i32
  }
  func.func @transform_4(%arg0: i32) -> (i32, i32) {
    %c0_i32 = arith.constant 0 : i32
    %c0_i32_0 = arith.constant 0 : i32
    %c0_i32_1 = arith.constant 0 : i32
    return %c0_i32, %c0_i32_0 : i32, i32
  }
  func.func @transform_5(%arg0: i32) -> (i32, i32) {
    %c0_i32 = arith.constant 0 : i32
    %c0_i32_0 = arith.constant 0 : i32
    %c0_i32_1 = arith.constant 0 : i32
    return %c0_i32, %c0_i32_0 : i32, i32
  }
  func.func @transform_6(%arg0: i32) -> (i32, i32) {
    %c0_i32 = arith.constant 0 : i32
    %c0_i32_0 = arith.constant 0 : i32
    %c0_i32_1 = arith.constant 0 : i32
    return %c0_i32, %c0_i32_0 : i32, i32
  }
  func.func @transform_7(%arg0: i32) -> (i32, i32) {
    %c0_i32 = arith.constant 0 : i32
    %c0_i32_0 = arith.constant 0 : i32
    return %arg0, %c0_i32 : i32, i32
  }
}

module attributes {stable_mosaic.version = 11 : i64} {
  func.func @_linear_kernel(%arg0: i32, %arg1: i32, %arg2: i32, %arg3: memref<16x32xf32, #tpu.memory_space<vmem>>, %arg4: memref<32x64xf32, #tpu.memory_space<vmem>>, %arg5: memref<1x64xf32, #tpu.memory_space<vmem>>, %arg6: memref<16x64xf32, #tpu.memory_space<vmem>>, %arg7: memref<16x64xf32, #tpu.memory_space<vmem>>) attributes {dimension_semantics = [#tpu.dimension_semantics<parallel>, #tpu.dimension_semantics<parallel>, #tpu.dimension_semantics<arbitrary>], iteration_bounds = array<i64: 1, 1, 1>, scalar_prefetch = 0 : i64, scratch_operands = 1 : i64, tpu.core_type = #tpu.core_type<tc>, window_params = [{transform_indices = @transform_0, window_bounds = array<i64: 16, 32>}, {transform_indices = @transform_1, window_bounds = array<i64: 32, 64>}, {transform_indices = @transform_2, window_bounds = array<i64: 1, 64>}, {transform_indices = @transform_3, window_bounds = array<i64: 16, 64>}]} {
    %c0_i32 = arith.constant 0 : i32
    %0 = arith.cmpi eq, %arg2, %c0_i32 : i32
    %1 = arith.extui %0 : i1 to i32
    %c0_i32_0 = arith.constant 0 : i32
    %2 = arith.cmpi ne, %1, %c0_i32_0 : i32
    scf.if %2 {
      %cst_10 = arith.constant 0.000000e+00 : f32
      %12 = vector.broadcast %cst_10 : f32 to vector<16x64xf32>
      %c0_11 = arith.constant 0 : index
      %c0_12 = arith.constant 0 : index
      %13 = vector.load %arg7[%c0_11, %c0_12] : memref<16x64xf32, #tpu.memory_space<vmem>>, vector<16x64xf32>
      tpu.vector_store %arg7[%c0_11, %c0_12], %12 {strides = array<i32>} : memref<16x64xf32, #tpu.memory_space<vmem>>, vector<16x64xf32>,
    } else {
    }
    %c0 = arith.constant 0 : index
    %c0_1 = arith.constant 0 : index
    %3 = vector.load %arg3[%c0, %c0_1] : memref<16x32xf32, #tpu.memory_space<vmem>>, vector<16x32xf32>
    %c0_2 = arith.constant 0 : index
    %c0_3 = arith.constant 0 : index
    %4 = vector.load %arg4[%c0_2, %c0_3] : memref<32x64xf32, #tpu.memory_space<vmem>>, vector<32x64xf32>
    %c0_4 = arith.constant 0 : index
    %c0_5 = arith.constant 0 : index
    %5 = vector.load %arg7[%c0_4, %c0_5] : memref<16x64xf32, #tpu.memory_space<vmem>>, vector<16x64xf32>
    %cst = arith.constant dense<0.000000e+00> : vector<16x64xf32>
    %6 = tpu.matmul %3, %4, %cst {dimension_numbers = #tpu.dot_dimension_numbers<[1], [0], [0], [1], [0, 0, 1, 1], [], []>} : vector<16x32xf32>, vector<32x64xf32>, vector<16x64xf32> -> vector<16x64xf32>
    %7 = arith.addf %5, %6 : vector<16x64xf32>
    %c0_6 = arith.constant 0 : index
    %c0_7 = arith.constant 0 : index
    %8 = vector.load %arg7[%c0_6, %c0_7] : memref<16x64xf32, #tpu.memory_space<vmem>>, vector<16x64xf32>
    tpu.vector_store %arg7[%c0_6, %c0_7], %7 {strides = array<i32>} : memref<16x64xf32, #tpu.memory_space<vmem>>, vector<16x64xf32>,
    %c0_i32_8 = arith.constant 0 : i32
    %9 = arith.cmpi eq, %arg2, %c0_i32_8 : i32
    %10 = arith.extui %9 : i1 to i32
    %c0_i32_9 = arith.constant 0 : i32
    %11 = arith.cmpi ne, %10, %c0_i32_9 : i32
    scf.if %11 {
      %c0_10 = arith.constant 0 : index
      %c0_11 = arith.constant 0 : index
      %12 = vector.load %arg7[%c0_10, %c0_11] : memref<16x64xf32, #tpu.memory_space<vmem>>, vector<16x64xf32>
      %c0_12 = arith.constant 0 : index
      %c0_13 = arith.constant 0 : index
      %13 = vector.load %arg5[%c0_12, %c0_13] : memref<1x64xf32, #tpu.memory_space<vmem>>, vector<1x64xf32>
      %14 = vector.broadcast %13 : vector<1x64xf32> to vector<16x64xf32>
      %15 = arith.addf %12, %14 : vector<16x64xf32>
      %c0_14 = arith.constant 0 : index
      %c0_15 = arith.constant 0 : index
      %16 = vector.load %arg6[%c0_14, %c0_15] : memref<16x64xf32, #tpu.memory_space<vmem>>, vector<16x64xf32>
      tpu.vector_store %arg6[%c0_14, %c0_15], %15 {strides = array<i32>} : memref<16x64xf32, #tpu.memory_space<vmem>>, vector<16x64xf32>,
    } else {
    }
    return
  }
  func.func @transform_0(%arg0: i32, %arg1: i32, %arg2: i32) -> (i32, i32) {
    %c0_i32 = arith.constant 0 : i32
    return %arg0, %arg2 : i32, i32
  }
  func.func @transform_1(%arg0: i32, %arg1: i32, %arg2: i32) -> (i32, i32) {
    %c0_i32 = arith.constant 0 : i32
    return %arg2, %arg1 : i32, i32
  }
  func.func @transform_2(%arg0: i32, %arg1: i32, %arg2: i32) -> (i32, i32) {
    %c0_i32 = arith.constant 0 : i32
    %c0_i32_0 = arith.constant 0 : i32
    return %c0_i32, %arg1 : i32, i32
  }
  func.func @transform_3(%arg0: i32, %arg1: i32, %arg2: i32) -> (i32, i32) {
    %c0_i32 = arith.constant 0 : i32
    return %arg0, %arg1 : i32, i32
  }
}

module attributes {stable_mosaic.version = 11 : i64} {
  func.func @_ln_kernel(%arg0: i32, %arg1: memref<16x32xf32, #tpu.memory_space<vmem>>, %arg2: memref<1x32xf32, #tpu.memory_space<vmem>>, %arg3: memref<1x32xf32, #tpu.memory_space<vmem>>, %arg4: memref<16x32xf32, #tpu.memory_space<vmem>>) attributes {dimension_semantics = [#tpu.dimension_semantics<parallel>], iteration_bounds = array<i64: 1>, scalar_prefetch = 0 : i64, scratch_operands = 0 : i64, tpu.core_type = #tpu.core_type<tc>, window_params = [{transform_indices = @transform_0, window_bounds = array<i64: 16, 32>}, {pipeline_mode = #tpu.pipeline_mode<synchronous>, transform_indices = @transform_1, window_bounds = array<i64: 1, 32>}, {pipeline_mode = #tpu.pipeline_mode<synchronous>, transform_indices = @transform_2, window_bounds = array<i64: 1, 32>}, {transform_indices = @transform_3, window_bounds = array<i64: 16, 32>}]} {
    %c0 = arith.constant 0 : index
    %c0_0 = arith.constant 0 : index
    %0 = vector.load %arg1[%c0, %c0_0] : memref<16x32xf32, #tpu.memory_space<vmem>>, vector<16x32xf32>
    %c0_1 = arith.constant 0 : index
    %c0_2 = arith.constant 0 : index
    %1 = vector.load %arg2[%c0_1, %c0_2] : memref<1x32xf32, #tpu.memory_space<vmem>>, vector<1x32xf32>
    %c0_3 = arith.constant 0 : index
    %c0_4 = arith.constant 0 : index
    %2 = vector.load %arg3[%c0_3, %c0_4] : memref<1x32xf32, #tpu.memory_space<vmem>>, vector<1x32xf32>
    %cst = arith.constant dense<0.000000e+00> : vector<16xf32>
    %3 = vector.multi_reduction <add>, %0, %cst [1] : vector<16x32xf32> to vector<16xf32>
    %4 = vector.shape_cast %3 : vector<16xf32> to vector<16x1xf32>
    %cst_5 = arith.constant 3.200000e+01 : f32
    %5 = vector.broadcast %cst_5 : f32 to vector<16x1xf32>
    %6 = arith.divf %4, %5 : vector<16x1xf32>
    %7 = vector.broadcast %6 : vector<16x1xf32> to vector<16x32xf32>
    %8 = arith.subf %0, %7 : vector<16x32xf32>
    %9 = arith.mulf %8, %8 : vector<16x32xf32>
    %cst_6 = arith.constant dense<0.000000e+00> : vector<16xf32>
    %10 = vector.multi_reduction <add>, %9, %cst_6 [1] : vector<16x32xf32> to vector<16xf32>
    %11 = vector.shape_cast %10 : vector<16xf32> to vector<16x1xf32>
    %cst_7 = arith.constant 3.200000e+01 : f32
    %12 = vector.broadcast %cst_7 : f32 to vector<16x1xf32>
    %13 = arith.divf %11, %12 : vector<16x1xf32>
    %14 = vector.broadcast %6 : vector<16x1xf32> to vector<16x32xf32>
    %15 = arith.subf %0, %14 : vector<16x32xf32>
    %cst_8 = arith.constant 9.99999974E-6 : f32
    %16 = vector.broadcast %cst_8 : f32 to vector<16x1xf32>
    %17 = arith.addf %13, %16 : vector<16x1xf32>
    %18 = math.rsqrt %17 : vector<16x1xf32>
    %19 = vector.broadcast %18 : vector<16x1xf32> to vector<16x32xf32>
    %20 = arith.mulf %15, %19 : vector<16x32xf32>
    %21 = vector.broadcast %1 : vector<1x32xf32> to vector<16x32xf32>
    %22 = arith.mulf %20, %21 : vector<16x32xf32>
    %23 = vector.broadcast %2 : vector<1x32xf32> to vector<16x32xf32>
    %24 = arith.addf %22, %23 : vector<16x32xf32>
    %c0_9 = arith.constant 0 : index
    %c0_10 = arith.constant 0 : index
    %25 = vector.load %arg4[%c0_9, %c0_10] : memref<16x32xf32, #tpu.memory_space<vmem>>, vector<16x32xf32>
    tpu.vector_store %arg4[%c0_9, %c0_10], %24 {strides = array<i32>} : memref<16x32xf32, #tpu.memory_space<vmem>>, vector<16x32xf32>,
    return
  }
  func.func @transform_0(%arg0: i32) -> (i32, i32) {
    %c0_i32 = arith.constant 0 : i32
    %c0_i32_0 = arith.constant 0 : i32
    return %arg0, %c0_i32 : i32, i32
  }
  func.func @transform_1(%arg0: i32) -> (i32, i32) {
    %c0_i32 = arith.constant 0 : i32
    %c0_i32_0 = arith.constant 0 : i32
    %c0_i32_1 = arith.constant 0 : i32
    return %c0_i32, %c0_i32_0 : i32, i32
  }
  func.func @transform_2(%arg0: i32) -> (i32, i32) {
    %c0_i32 = arith.constant 0 : i32
    %c0_i32_0 = arith.constant 0 : i32
    %c0_i32_1 = arith.constant 0 : i32
    return %c0_i32, %c0_i32_0 : i32, i32
  }
  func.func @transform_3(%arg0: i32) -> (i32, i32) {
    %c0_i32 = arith.constant 0 : i32
    %c0_i32_0 = arith.constant 0 : i32
    return %arg0, %c0_i32 : i32, i32
  }
}

module attributes {stable_mosaic.version = 11 : i64} {
  func.func @_linear_kernel(%arg0: i32, %arg1: i32, %arg2: i32, %arg3: memref<16x32xf32, #tpu.memory_space<vmem>>, %arg4: memref<32x100xf32, #tpu.memory_space<vmem>>, %arg5: memref<1x100xf32, #tpu.memory_space<vmem>>, %arg6: memref<16x100xf32, #tpu.memory_space<vmem>>, %arg7: memref<16x100xf32, #tpu.memory_space<vmem>>) attributes {dimension_semantics = [#tpu.dimension_semantics<parallel>, #tpu.dimension_semantics<parallel>, #tpu.dimension_semantics<arbitrary>], iteration_bounds = array<i64: 1, 1, 1>, scalar_prefetch = 0 : i64, scratch_operands = 1 : i64, tpu.core_type = #tpu.core_type<tc>, window_params = [{transform_indices = @transform_0, window_bounds = array<i64: 16, 32>}, {transform_indices = @transform_1, window_bounds = array<i64: 32, 100>}, {transform_indices = @transform_2, window_bounds = array<i64: 1, 100>}, {transform_indices = @transform_3, window_bounds = array<i64: 16, 100>}]} {
    %c0_i32 = arith.constant 0 : i32
    %0 = arith.cmpi eq, %arg2, %c0_i32 : i32
    %1 = arith.extui %0 : i1 to i32
    %c0_i32_0 = arith.constant 0 : i32
    %2 = arith.cmpi ne, %1, %c0_i32_0 : i32
    scf.if %2 {
      %cst_10 = arith.constant 0.000000e+00 : f32
      %12 = vector.broadcast %cst_10 : f32 to vector<16x100xf32>
      %c0_11 = arith.constant 0 : index
      %c0_12 = arith.constant 0 : index
      %13 = vector.load %arg7[%c0_11, %c0_12] : memref<16x100xf32, #tpu.memory_space<vmem>>, vector<16x100xf32>
      tpu.vector_store %arg7[%c0_11, %c0_12], %12 {strides = array<i32>} : memref<16x100xf32, #tpu.memory_space<vmem>>, vector<16x100xf32>,
    } else {
    }
    %c0 = arith.constant 0 : index
    %c0_1 = arith.constant 0 : index
    %3 = vector.load %arg3[%c0, %c0_1] : memref<16x32xf32, #tpu.memory_space<vmem>>, vector<16x32xf32>
    %c0_2 = arith.constant 0 : index
    %c0_3 = arith.constant 0 : index
    %4 = vector.load %arg4[%c0_2, %c0_3] : memref<32x100xf32, #tpu.memory_space<vmem>>, vector<32x100xf32>
    %c0_4 = arith.constant 0 : index
    %c0_5 = arith.constant 0 : index
    %5 = vector.load %arg7[%c0_4, %c0_5] : memref<16x100xf32, #tpu.memory_space<vmem>>, vector<16x100xf32>
    %cst = arith.constant dense<0.000000e+00> : vector<16x100xf32>
    %6 = tpu.matmul %3, %4, %cst {dimension_numbers = #tpu.dot_dimension_numbers<[1], [0], [0], [1], [0, 0, 1, 1], [], []>} : vector<16x32xf32>, vector<32x100xf32>, vector<16x100xf32> -> vector<16x100xf32>
    %7 = arith.addf %5, %6 : vector<16x100xf32>
    %c0_6 = arith.constant 0 : index
    %c0_7 = arith.constant 0 : index
    %8 = vector.load %arg7[%c0_6, %c0_7] : memref<16x100xf32, #tpu.memory_space<vmem>>, vector<16x100xf32>
    tpu.vector_store %arg7[%c0_6, %c0_7], %7 {strides = array<i32>} : memref<16x100xf32, #tpu.memory_space<vmem>>, vector<16x100xf32>,
    %c0_i32_8 = arith.constant 0 : i32
    %9 = arith.cmpi eq, %arg2, %c0_i32_8 : i32
    %10 = arith.extui %9 : i1 to i32
    %c0_i32_9 = arith.constant 0 : i32
    %11 = arith.cmpi ne, %10, %c0_i32_9 : i32
    scf.if %11 {
      %c0_10 = arith.constant 0 : index
      %c0_11 = arith.constant 0 : index
      %12 = vector.load %arg7[%c0_10, %c0_11] : memref<16x100xf32, #tpu.memory_space<vmem>>, vector<16x100xf32>
      %c0_12 = arith.constant 0 : index
      %c0_13 = arith.constant 0 : index
      %13 = vector.load %arg5[%c0_12, %c0_13] : memref<1x100xf32, #tpu.memory_space<vmem>>, vector<1x100xf32>
      %14 = vector.broadcast %13 : vector<1x100xf32> to vector<16x100xf32>
      %15 = arith.addf %12, %14 : vector<16x100xf32>
      %c0_14 = arith.constant 0 : index
      %c0_15 = arith.constant 0 : index
      %16 = vector.load %arg6[%c0_14, %c0_15] : memref<16x100xf32, #tpu.memory_space<vmem>>, vector<16x100xf32>
      tpu.vector_store %arg6[%c0_14, %c0_15], %15 {strides = array<i32>} : memref<16x100xf32, #tpu.memory_space<vmem>>, vector<16x100xf32>,
    } else {
    }
    return
  }
  func.func @transform_0(%arg0: i32, %arg1: i32, %arg2: i32) -> (i32, i32) {
    %c0_i32 = arith.constant 0 : i32
    return %arg0, %arg2 : i32, i32
  }
  func.func @transform_1(%arg0: i32, %arg1: i32, %arg2: i32) -> (i32, i32) {
    %c0_i32 = arith.constant 0 : i32
    return %arg2, %arg1 : i32, i32
  }
  func.func @transform_2(%arg0: i32, %arg1: i32, %arg2: i32) -> (i32, i32) {
    %c0_i32 = arith.constant 0 : i32
    %c0_i32_0 = arith.constant 0 : i32
    return %c0_i32, %arg1 : i32, i32
  }
  func.func @transform_3(%arg0: i32, %arg1: i32, %arg2: i32) -> (i32, i32) {
    %c0_i32 = arith.constant 0 : i32
    return %arg0, %arg1 : i32, i32
  }
}

</mosaic_0001>

<bundles_post_ra>
// kernel: transformer_forward.38
= control target key start
LH: loop header
LB: loop body
LE: loop exit
PB: predicated region body
PF: predicated region fallthrough
CT: control target
= control target key end

     0   :  { %vm36_vm0 = vcmask 261120   ;;  %s289_s1 = inlined_call_operand.vmem [shape: f32[32,32], index: 1, kind: input, shape index: {}]   ;;  %s290_s0 = inlined_call_operand.vmem [shape: f32[16,32], index: 0, kind: input, shape index: {}]   ;;  %s291_s2 = inlined_call_operand.vmem [shape: f32[1,32], index: 2, kind: input, shape index: {}]   ;;  %s292_s3 = inlined_call_operand.vmem [shape: f32[16,32], index: 3, kind: input, shape index: {}]   ;;  %s293_s4 = inlined_call_operand.vmem [shape: f32[1,32], index: 4, kind: input, shape index: {}]   ;;  %s294_s5 = inlined_call_operand.vmem [shape: f32[1,32], index: 5, kind: input, shape index: {}]   ;;  %s295_s6 = inlined_call_operand.vmem [shape: f32[16,32], index: 6, kind: output, shape index: {}]  }
   0x1   :  { %v25_v0 = vld [vmem:[%s289_s1] sm:$0xff]  ;;  %v26_v1 = vld [vmem:[%s289_s1 + $0x8] sm:$0xff]  ;;  %v27_v2 = vld [vmem:[%s289_s1 + $0x10] sm:$0xff] }
   0x2   :  { %v195_v3 = vpack.c.bf16 %v26_v1, %v25_v0  ;;  %v28_v4 = vld [vmem:[%s289_s1 + $0x18] sm:$0xff]  ;;  %v23_v5 = vld [vmem:[%s290_s0] sm:$0xff]  ;;  %v24_v7 = vld [vmem:[%s290_s0 + $0x8] sm:$0xff] }
   0x3   :  { %v199_v6 = vpack.c.bf16 %v28_v4, %v27_v2  ;;  %192 = vmatprep.mubr.msk.f32.mxu0 %vm36_vm0, %v23_v5  ;;  %v173_v8 = vld [vmem:[%s291_s2] ss:$0 sm:$0xff]  ;;  %v119_v14 = vld [vmem:[%s292_s3 + $0x8] sm:$0xff] }
   0x4   :  { %196 = vmatprep.subr.bf16.mxu0 %v195_v3  ;;  %v118_v11 = vld [vmem:[%s292_s3] sm:$0xff] }
   0x5   :  { %198 = vmatpush3.bf16.msra.mxu0 %v195_v3  ;;  %v176_v36 = vld [vmem:[%s293_s4] ss:$0 sm:$0xff] }
   0x6   :  { %200 = vmatprep.subr.bf16.mxu0 %v199_v6  ;;  %v177_v38 = vld [vmem:[%s294_s5] ss:$0 sm:$0xff] }
   0x9   :  { %202 = vmatpush3.bf16.msra.mxu0 %v199_v6 }
   0xc   :  { %193 = vmatmul.mubr.msk.f32.vlgmr.msra.gmra.mrb[0].mxu0 %vm36_vm0, %v24_v7 }
  0xdf   :  { %v194_v9 = vpop.f32.mrb[0].mxu0 }
  0xe0   :  { %v109_v10 = vpop.f32.mrb[1].mxu0  ;;  %v115_v12 = vadd.f32 %v194_v9, %v173_v8 }
  0xe1   :  { %v110_v13 = vadd.f32 %v173_v8, %v109_v10 }
  0xe2   :  { %v121_v17 = vadd.f32 %v119_v14, %v115_v12 }
  0xe3   :  { %v120_v15 = vadd.f32 %v118_v11, %v110_v13 }
  0xe4   :  { %v127_v18 = vsel %vm36_vm0, %v121_v17, 0.0 }
  0xe5   :  { %v124_v16 = vsel %vm36_vm0, %v120_v15, 0.0 }
  0xe6   :  { %125 = vadd.xlane.f32.xlu0 %v124_v16 }
  0xea   :  { %128 = vadd.xlane.f32.xlu0 %v127_v18 }
 0x173   :  { %v126_v19 = vpop.xlane.xlu0 %125 }
 0x174   :  { %v131_v20 = vmul.f32 0.03125, %v126_v19 }
 0x176   :  { %v133_v21 = vsub.f32 %v120_v15, %v131_v20 }
 0x177   :  { %v129_v22 = vpop.xlane.xlu0 %128 }
 0x178   :  { %v132_v23 = vmul.f32 0.03125, %v129_v22  ;;  %v135_v24 = vmul.f32 %v133_v21, %v133_v21 }
 0x17a   :  { %v134_v25 = vsub.f32 %v121_v17, %v132_v23  ;;  %v137_v26 = vsel %vm36_vm0, %v135_v24, 0.0 }
 0x17b   :  { %138 = vadd.xlane.f32.xlu1 %v137_v26 }
 0x17c   :  { %v136_v27 = vmul.f32 %v134_v25, %v134_v25 }
 0x17e   :  { %v140_v28 = vsel %vm36_vm0, %v136_v27, 0.0 }
 0x17f   :  { %141 = vadd.xlane.f32.xlu1 %v140_v28 }
 0x208   :  { %v139_v29 = vpop.xlane.xlu1 %138 }
 0x209   :  { %v143_v30 = vmul.f32 0.03125, %v139_v29 }
 0x20b   :  { %v145_v31 = vadd.f32 1e-05, %v143_v30 }
 0x20c   :  { %v142_v32 = vpop.xlane.xlu1 %141 }
 0x20d   :  { %203 = vrsqrt.f32 %v145_v31  ;;  %v144_v33 = vmul.f32 0.03125, %v142_v32 }
 0x20f   :  { %v146_v34 = vadd.f32 1e-05, %v144_v33 }
 0x211   :  { %205 = vrsqrt.f32 %v146_v34 }
 0x217   :  { %v204_v35 = vpop.eup %203 }
 0x218   :  { %v149_v37 = vmul.f32 %v204_v35, %v133_v21 }
 0x21a   :  { %v157_v39 = vmul.f32 %v176_v36, %v149_v37 }
 0x21b   :  { %v206_v40 = vpop.eup %205 }
 0x21c   :  { %v165_v41 = vadd.f32 %v177_v38, %v157_v39  ;;  %v150_v42 = vmul.f32 %v206_v40, %v134_v25 }
 0x21e   :  { %167 = vst.msk [vmem:[%s295_s6] sm:$0xff] %vm36_vm0, %v165_v41  ;;  %v158_v43 = vmul.f32 %v176_v36, %v150_v42 }
 0x220   :  { %v166_v44 = vadd.f32 %v177_v38, %v158_v43 }
 0x222   :  { %168 = vst.msk [vmem:[%s295_s6 + $0x8] sm:$0xff] %vm36_vm0, %v166_v44 }

// kernel: transformer_forward.36
= control target key start
LH: loop header
LB: loop body
LE: loop exit
PB: predicated region body
PF: predicated region fallthrough
CT: control target
= control target key end

     0   :  { %vm29_vm0 = vcmask 261120   ;;  %vm18_vm1 = vcmask 785408   ;;  %v165_v3 = vmov 0.0   ;;  %s221_s1 = inlined_call_operand.vmem [shape: f32[32,96], index: 1, kind: input, shape index: {}]   ;;  %s222_s0 = inlined_call_operand.vmem [shape: f32[16,32], index: 0, kind: input, shape index: {}]   ;;  %s223_s2 = inlined_call_operand.vmem [shape: f32[1,96], index: 2, kind: input, shape index: {}]   ;;  %s224_s3 = inlined_call_operand.vmem [shape: f32[16,96], index: 3, kind: output, shape index: {}]  }
   0x1   :  { %v23_v0 = vld [vmem:[%s221_s1] sm:$0xff]  ;;  %v24_v1 = vld [vmem:[%s221_s1 + $0x8] sm:$0xff]  ;;  %v25_v2 = vld [vmem:[%s221_s1 + $0x10] sm:$0xff]  ;;  %20 = vst.msk [vmem:[#allocation2 + $0x8] sm:$0xff] %vm18_vm1, %v165_v3 }
   0x2   :  { %19 = vst.msk [vmem:[#allocation2] sm:$0xff] %vm18_vm1, %v165_v3  ;;  %v156_v4 = vpack.c.bf16 %v24_v1, %v23_v0  ;;  %v26_v5 = vld [vmem:[%s221_s1 + $0x18] sm:$0xff]  ;;  %v21_v6 = vld [vmem:[%s222_s0] sm:$0xff]  ;;  %v22_v8 = vld [vmem:[%s222_s0 + $0x8] sm:$0xff] }
   0x3   :  { %v160_v7 = vpack.c.bf16 %v26_v5, %v25_v2  ;;  %153 = vmatprep.mubr.msk.f32.mxu0 %vm29_vm0, %v21_v6  ;;  %v138_v15 = vld [vmem:[%s223_s2] ss:$0 sm:$0xff] }
   0x4   :  { %157 = vmatprep.subr.bf16.mxu0 %v156_v4 }
   0x5   :  { %159 = vmatpush3.bf16.msra.mxu0 %v156_v4 }
   0x6   :  { %161 = vmatprep.subr.bf16.mxu0 %v160_v7 }
   0x8   :  { %v28_v9 = vld [vmem:[#allocation2 + $0x8] sm:$0xff] }
   0x9   :  { %163 = vmatpush3.bf16.msra.mxu0 %v160_v7  ;;  %v27_v10 = vld [vmem:[#allocation2] sm:$0xff] }
   0xc   :  { %154 = vmatmul.mubr.msk.f32.vlgmr.msra.gmra.mrb[0].mxu0 %vm29_vm0, %v22_v8 }
  0xdf   :  { %v155_v11 = vpop.f32.mrb[0].mxu0 }
  0xe0   :  { %v112_v12 = vadd.f32 %v155_v11, %v28_v9  ;;  %v102_v13 = vpop.f32.mrb[1].mxu0 }
  0xe1   :  { %v111_v14 = vadd.f32 %v102_v13, %v27_v10 }
  0xe2   :  { %115 = vst.msk [vmem:[#allocation2 + $0x8] sm:$0xff] %vm18_vm1, %v112_v12 }
  0xe3   :  { %114 = vst.msk [vmem:[#allocation2] sm:$0xff] %vm18_vm1, %v111_v14 }
  0xe9   :  { %v120_v16 = vld [vmem:[#allocation2 + $0x8] sm:$0xff] }
  0xea   :  { %v129_v17 = vadd.f32 %v138_v15, %v120_v16  ;;  %v119_v18 = vld [vmem:[#allocation2] sm:$0xff] }
  0xeb   :  { %v128_v19 = vadd.f32 %v138_v15, %v119_v18 }
  0xec   :  { %131 = vst.msk [vmem:[%s224_s3 + $0x8] sm:$0xff] %vm18_vm1, %v129_v17 }
  0xed   :  { %130 = vst.msk [vmem:[%s224_s3] sm:$0xff] %vm18_vm1, %v128_v19 }

// kernel: transformer_forward.39
= control target key start
LH: loop header
LB: loop body
LE: loop exit
PB: predicated region body
PF: predicated region fallthrough
CT: control target
= control target key end

     0   :  { %vm18_vm0 = vcmask 261120   ;;  %v164_v3 = vmov 0.0   ;;  %s220_s1 = inlined_call_operand.vmem [shape: f32[32,32], index: 1, kind: input, shape index: {}]   ;;  %s221_s0 = inlined_call_operand.vmem [shape: f32[16,32], index: 0, kind: input, shape index: {}]   ;;  %s222_s2 = inlined_call_operand.vmem [shape: f32[1,32], index: 2, kind: input, shape index: {}]   ;;  %s223_s3 = inlined_call_operand.vmem [shape: f32[16,32], index: 3, kind: output, shape index: {}]  }
   0x1   :  { %v23_v0 = vld [vmem:[%s220_s1] sm:$0xff]  ;;  %v24_v1 = vld [vmem:[%s220_s1 + $0x8] sm:$0xff]  ;;  %v25_v2 = vld [vmem:[%s220_s1 + $0x10] sm:$0xff]  ;;  %20 = vst.msk [vmem:[#allocation2 + $0x8] sm:$0xff] %vm18_vm0, %v164_v3 }
   0x2   :  { %19 = vst.msk [vmem:[#allocation2] sm:$0xff] %vm18_vm0, %v164_v3  ;;  %v155_v4 = vpack.c.bf16 %v24_v1, %v23_v0  ;;  %v26_v5 = vld [vmem:[%s220_s1 + $0x18] sm:$0xff]  ;;  %v21_v6 = vld [vmem:[%s221_s0] sm:$0xff]  ;;  %v22_v8 = vld [vmem:[%s221_s0 + $0x8] sm:$0xff] }
   0x3   :  { %v159_v7 = vpack.c.bf16 %v26_v5, %v25_v2  ;;  %152 = vmatprep.mubr.msk.f32.mxu0 %vm18_vm0, %v21_v6  ;;  %v137_v15 = vld [vmem:[%s222_s2] ss:$0 sm:$0xff] }
   0x4   :  { %156 = vmatprep.subr.bf16.mxu0 %v155_v4 }
   0x5   :  { %158 = vmatpush3.bf16.msra.mxu0 %v155_v4 }
   0x6   :  { %160 = vmatprep.subr.bf16.mxu0 %v159_v7 }
   0x8   :  { %v28_v9 = vld [vmem:[#allocation2 + $0x8] sm:$0xff] }
   0x9   :  { %162 = vmatpush3.bf16.msra.mxu0 %v159_v7  ;;  %v27_v10 = vld [vmem:[#allocation2] sm:$0xff] }
   0xc   :  { %153 = vmatmul.mubr.msk.f32.vlgmr.msra.gmra.mrb[0].mxu0 %vm18_vm0, %v22_v8 }
  0xdf   :  { %v154_v11 = vpop.f32.mrb[0].mxu0 }
  0xe0   :  { %v112_v12 = vadd.f32 %v154_v11, %v28_v9  ;;  %v102_v13 = vpop.f32.mrb[1].mxu0 }
  0xe1   :  { %v111_v14 = vadd.f32 %v102_v13, %v27_v10 }
  0xe2   :  { %114 = vst.msk [vmem:[#allocation2 + $0x8] sm:$0xff] %vm18_vm0, %v112_v12 }
  0xe3   :  { %113 = vst.msk [vmem:[#allocation2] sm:$0xff] %vm18_vm0, %v111_v14 }
  0xe9   :  { %v119_v16 = vld [vmem:[#allocation2 + $0x8] sm:$0xff] }
  0xea   :  { %v128_v17 = vadd.f32 %v137_v15, %v119_v16  ;;  %v118_v18 = vld [vmem:[#allocation2] sm:$0xff] }
  0xeb   :  { %v127_v19 = vadd.f32 %v137_v15, %v118_v18 }
  0xec   :  { %130 = vst.msk [vmem:[%s223_s3 + $0x8] sm:$0xff] %vm18_vm0, %v128_v17 }
  0xed   :  { %129 = vst.msk [vmem:[%s223_s3] sm:$0xff] %vm18_vm0, %v127_v19 }

// kernel: transformer_forward.37
= control target key start
LH: loop header
LB: loop body
LE: loop exit
PB: predicated region body
PF: predicated region fallthrough
CT: control target
= control target key end

     0   :  { %s1094_s12 = smov 0   ;;  %s1171_s0 = inlined_call_operand.vmem [shape: f32[2,4,8,8], index: 0, kind: input, shape index: {}]   ;;  %s1172_s1 = inlined_call_operand.vmem [shape: f32[2,4,8,8], index: 1, kind: input, shape index: {}]   ;;  %s1173_s2 = inlined_call_operand.vmem [shape: f32[2,4,8,8], index: 2, kind: input, shape index: {}]   ;;  %s1174_s3 = inlined_call_operand.vmem [shape: f32[2,4,8,8], index: 3, kind: output, shape index: {}]  }
   0x1 LB: > { %s951_s13 = sadd.s32 4294967295, %s1070_s12   ;;  %p955_p0 = scmp.ge.s32.totalorder %s1070_s12, 1  ;;  %s1070_s12 = sphi %s1094_s12, %s13_s12  }
   0x2   : > { %p157_p1 = scmp.lt.s32.totalorder %s1070_s12, 3 }
   0x4   : > { %p158_p2 = pnand %p955_p0, %p157_p1 }
   0x5   : > { %p191_p3 = scmp.lt.s32.totalorder (!%p158_p2), %s951_s13, 1  ;;  %v1072_v0 = vmov (!%p158_p2), 0.0   ;;  %vm1073_vm0 = vmmov (!%p158_p2), 0   ;;  %vm223_vm1 = vcmask (!%p158_p2), 64512  }
   0x6   : > { %161 = sbr.rel (%p158_p2) target bundleno = 615 (0x267), region = 32  ;;  %998 = vmatprep.subr.mxu0 (!%p158_p2), %v1072_v0  ;;  %1000 = vmatprep.mubr.msk.f32.mxu0 (!%p158_p2), %vm1073_vm0, %v1072_v0 }
   0x7   : > { %1003 = vmatprep.subr.mxu1 (!%p158_p2), %v1072_v0  ;;  %1005 = vmatprep.mubr.msk.f32.mxu1 (!%p158_p2), %vm1073_vm0, %v1072_v0 }
   0xd   : > { %s1176_s13 = smov (!%p191_p3, %s951_s13), 1 }
   0xe   : > { %s1108_s14 = sshll.u32 %s1176_s13, 5 }
   0xf   : > { %s200_s17 = scalar_lea.vmem %s1172_s1, %s1108_s14  ;;  %s195_s20 = scalar_lea.vmem %s1171_s0, %s1108_s14 }
  0x10   : > { %v215_v1 = vld [vmem:[%s200_s17] sm:$0xff]  ;;  %v216_v2 = vld [vmem:[%s200_s17 + $0x8] sm:$0xff]  ;;  %v217_v5 = vld [vmem:[%s200_s17 + $0x10] sm:$0xff]  ;;  %s205_s23 = scalar_lea.vmem %s1173_s2, %s1108_s14  ;;  %s210_s26 = scalar_lea.vmem %s1174_s3, %s1108_s14 }
  0x11   : > { %999 = vmatpush3.xpose.msk.msra.mxu0 %vm223_vm1, %v215_v1  ;;  %v211_v3 = vld [vmem:[%s195_s20] sm:$0xff]  ;;  %1004 = vmatpush3.xpose.msk.msra.mxu1 %vm223_vm1, %v216_v2  ;;  %v212_v4 = vld [vmem:[%s195_s20 + $0x8] sm:$0xff]  ;;  %v218_v6 = vld [vmem:[%s200_s17 + $0x18] sm:$0xff] }
  0x12   : > { %1008 = vmatprep.subr.mxu0 %v1072_v0  ;;  %1013 = vmatprep.subr.mxu1 %v1072_v0  ;;  %v213_v7 = vld [vmem:[%s195_s20 + $0x10] sm:$0xff]  ;;  %v214_v8 = vld [vmem:[%s195_s20 + $0x18] sm:$0xff]  ;;  %v219_v25 = vld [vmem:[%s205_s23] sm:$0xff] }
  0x13   : > { %v220_v26 = vld [vmem:[%s205_s23 + $0x8] sm:$0xff]  ;;  %v221_v39 = vld [vmem:[%s205_s23 + $0x10] sm:$0xff]  ;;  %v222_v42 = vld [vmem:[%s205_s23 + $0x18] sm:$0xff] }
  0x14   : > { %1001 = vmatmul.mubr.msk.f32.vlgmr.msra.gmra.mrb[0].mxu0 %vm223_vm1, %v211_v3  ;;  %1006 = vmatmul.mubr.msk.f32.vlgmr.msra.gmra.mrb[0].mxu1 %vm223_vm1, %v212_v4 }
  0x15   : > { %1009 = vmatpush3.xpose.msk.msra.mxu0 %vm223_vm1, %v217_v5  ;;  %1010 = vmatprep.mubr.msk.f32.mxu0 %vm1073_vm0, %v1072_v0 }
  0x16   : > { %1014 = vmatpush3.xpose.msk.msra.mxu1 %vm223_vm1, %v218_v6  ;;  %1015 = vmatprep.mubr.msk.f32.mxu1 %vm1073_vm0, %v1072_v0 }
  0x17   : > { %1018 = vmatprep.subr.mxu0 %v1072_v0  ;;  %1023 = vmatprep.subr.mxu1 %v1072_v0 }
  0x18   : > { %1011 = vmatmul.mubr.msk.f32.vlgmr.msra.gmra.mrb[2].mxu0 %vm223_vm1, %v213_v7 }
  0x19   : > { %1016 = vmatmul.mubr.msk.f32.vlgmr.msra.gmra.mrb[2].mxu1 %vm223_vm1, %v214_v8  ;;  %1020 = vmatprep.mubr.msk.f32.mxu0 %vm1073_vm0, %v1072_v0 }
  0x1a   : > { %1025 = vmatprep.mubr.msk.f32.mxu1 %vm1073_vm0, %v1072_v0  ;;  %1019 = vmatpush3.msra.mxu0 %v219_v25 }
  0x1b   : > { %1028 = vmatprep.subr.mxu0 %v1072_v0  ;;  %1024 = vmatpush3.msra.mxu1 %v220_v26 }
  0x1c   : > { %1033 = vmatprep.subr.mxu1 %v1072_v0 }
  0xe7   : > { %v296_v9 = vpop.f32.mrb[0].mxu0  ;;  %v372_v10 = vpop.f32.mrb[0].mxu1 }
  0xe8   : > { %v528_v11 = vmul.f32 0.35355338, %v296_v9  ;;  %v1002_v12 = vpop.f32.mrb[1].mxu0  ;;  %v529_v13 = vmul.f32 0.35355338, %v372_v10  ;;  %v1007_v14 = vpop.f32.mrb[1].mxu1 }
  0xea   : > { %v532_v15 = vsel %vm223_vm1, %v528_v11, -inf  ;;  %v535_v20 = vsel %vm223_vm1, %v529_v13, -inf }
  0xeb   : > { %533 = vmax.xlane.f32.xlu0 %v532_v15  ;;  %v448_v16 = vpop.f32.mrb[2].mxu0 }
  0xec   : > { %v530_v17 = vmul.f32 0.35355338, %v448_v16  ;;  %v1012_v18 = vpop.f32.mrb[3].mxu0  ;;  %v524_v19 = vpop.f32.mrb[2].mxu1 }
  0xed   : > { %v531_v21 = vmul.f32 0.35355338, %v524_v19  ;;  %v1017_v22 = vpop.f32.mrb[3].mxu1 }
  0xee   : > { %v538_v23 = vsel %vm223_vm1, %v530_v17, -inf }
  0xef   : > { %536 = vmax.xlane.f32.xlu0 %v535_v20  ;;  %539 = vmax.xlane.f32.xlu1 %v538_v23  ;;  %v541_v24 = vsel %vm223_vm1, %v531_v21, -inf }
  0xf3   : > { %542 = vmax.xlane.f32.xlu1 %v541_v24 }
 0x178   : > { %v534_v27 = vpop.xlane.xlu0 %533 }
 0x179   : > { %v544_v28 = vsub.f32 %v528_v11, %v534_v27 }
 0x17b   : > { %v548_v29 = vmul.f32 1.442695, %v544_v28 }
 0x17c   : > { %v537_v30 = vpop.xlane.xlu0 %536  ;;  %v540_v31 = vpop.xlane.xlu1 %539 }
 0x17d   : > { %1048 = vpow2.f32 %v548_v29  ;;  %v545_v32 = vsub.f32 %v529_v13, %v537_v30  ;;  %v546_v33 = vsub.f32 %v530_v17, %v540_v31 }
 0x17f   : > { %v550_v34 = vmul.f32 1.442695, %v545_v32  ;;  %v552_v35 = vmul.f32 1.442695, %v546_v33 }
 0x180   : > { %v543_v36 = vpop.xlane.xlu1 %542 }
 0x181   : > { %1050 = vpow2.f32 %v550_v34  ;;  %v547_v37 = vsub.f32 %v531_v21, %v543_v36 }
 0x182   : > { %1052 = vpow2.f32 %v552_v35 }
 0x183   : > { %v554_v38 = vmul.f32 1.442695, %v547_v37 }
 0x185   : > { %1054 = vpow2.f32 %v554_v38 }
 0x187   : > { %v1049_v40 = vpop.eup %1048 }
 0x188   : > { %1021 = vmatmul.mubr.msk.f32.vlgmr.msra.gmra.mrb[4].mxu0 %vm223_vm1, %v1049_v40  ;;  %v556_v41 = vsel %vm223_vm1, %v1049_v40, 0.0 }
 0x189   : > { %557 = vadd.xlane.f32.xlu0 %v556_v41  ;;  %1029 = vmatpush3.msra.mxu0 %v221_v39 }
 0x18a   : > { %1030 = vmatprep.mubr.msk.f32.mxu0 %vm1073_vm0, %v1072_v0 }
 0x18b   : > { %v1051_v43 = vpop.eup %1050 }
 0x18c   : > { %v1053_v44 = vpop.eup %1052  ;;  %1026 = vmatmul.mubr.msk.f32.vlgmr.msra.gmra.mrb[4].mxu1 %vm223_vm1, %v1051_v43  ;;  %v559_v45 = vsel %vm223_vm1, %v1051_v43, 0.0 }
 0x18d   : > { %1031 = vmatmul.mubr.msk.f32.vlgmr.msra.gmra.mrb[6].mxu0 %vm223_vm1, %v1053_v44  ;;  %1034 = vmatpush3.msra.mxu1 %v222_v42  ;;  %v562_v46 = vsel %vm223_vm1, %v1053_v44, 0.0 }
 0x18e   : > { %560 = vadd.xlane.f32.xlu1 %v559_v45  ;;  %563 = vadd.xlane.f32.xlu0 %v562_v46 }
 0x18f   : > { %v1055_v47 = vpop.eup %1054  ;;  %1035 = vmatprep.mubr.msk.f32.mxu1 %vm1073_vm0, %v1072_v0 }
 0x190   : > { %1036 = vmatmul.mubr.msk.f32.vlgmr.msra.gmra.mrb[6].mxu1 %vm223_vm1, %v1055_v47  ;;  %v565_v48 = vsel %vm223_vm1, %v1055_v47, 0.0 }
 0x192   : > { %566 = vadd.xlane.f32.xlu1 %v565_v48 }
 0x216   : > { %v558_v49 = vpop.xlane.xlu0 %557 }
 0x217   : > { %1056 = vrcp.f32 %v558_v49 }
 0x21b   : > { %v561_v50 = vpop.xlane.xlu1 %560  ;;  %v564_v51 = vpop.xlane.xlu0 %563 }
 0x21c   : > { %1058 = vrcp.f32 %v561_v50 }
 0x21d   : > { %1060 = vrcp.f32 %v564_v51 }
 0x21f   : > { %v567_v52 = vpop.xlane.xlu1 %566 }
 0x220   : > { %1062 = vrcp.f32 %v567_v52 }
 0x221   : > { %v1057_v53 = vpop.eup %1056 }
 0x226   : > { %v1059_v57 = vpop.eup %1058 }
 0x227   : > { %v1061_v59 = vpop.eup %1060 }
 0x22a   : > { %v1063_v1 = vpop.eup %1062 }
 0x25b   : > { %v637_v54 = vpop.f32.mrb[4].mxu0 }
 0x25c   : > { %v864_v55 = vmul.f32 %v1057_v53, %v637_v54  ;;  %v1022_v56 = vpop.f32.mrb[5].mxu0 }
 0x25e   : > { %868 = vst.msk [vmem:[%s210_s26] sm:$0xff] %vm223_vm1, %v864_v55 }
 0x25f   : > { %v710_v58 = vpop.f32.mrb[4].mxu1 }
 0x260   : > { %v865_v60 = vmul.f32 %v1059_v57, %v710_v58  ;;  %v783_v61 = vpop.f32.mrb[6].mxu0  ;;  %v1027_v62 = vpop.f32.mrb[5].mxu1 }
 0x261   : > { %v866_v63 = vmul.f32 %v1061_v59, %v783_v61  ;;  %v1032_v0 = vpop.f32.mrb[7].mxu0 }
 0x262   : > { %869 = vst.msk [vmem:[%s210_s26 + $0x8] sm:$0xff] %vm223_vm1, %v865_v60 }
 0x263   : > { %870 = vst.msk [vmem:[%s210_s26 + $0x10] sm:$0xff] %vm223_vm1, %v866_v63  ;;  %v856_v2 = vpop.f32.mrb[6].mxu1 }
 0x264   : > { %v867_v3 = vmul.f32 %v1063_v1, %v856_v2  ;;  %v1037_v4 = vpop.f32.mrb[7].mxu1 }
 0x266   : > { %871 = vst.msk [vmem:[%s210_s26 + $0x18] sm:$0xff] %vm223_vm1, %v867_v3 }
 0x267 PF: > { %s13_s12 = sadd.s32 1, %s1070_s12  }
 0x268   : > { %p10_p4 = scmp.ge.s32.totalorder %s13_s12, 4  }
 0x26a   :  { %12 = sbr.rel (!%p10_p4) target bundleno = 1 (0x1), region = 68 }

// kernel: transformer_forward.40
= control target key start
LH: loop header
LB: loop body
LE: loop exit
PB: predicated region body
PF: predicated region fallthrough
CT: control target
= control target key end

     0   :  { %vm29_vm0 = vcmask 261120   ;;  %vm18_vm1 = vcmask 523264   ;;  %v165_v3 = vmov 0.0   ;;  %s221_s1 = inlined_call_operand.vmem [shape: f32[32,64], index: 1, kind: input, shape index: {}]   ;;  %s222_s0 = inlined_call_operand.vmem [shape: f32[16,32], index: 0, kind: input, shape index: {}]   ;;  %s223_s2 = inlined_call_operand.vmem [shape: f32[1,64], index: 2, kind: input, shape index: {}]   ;;  %s224_s3 = inlined_call_operand.vmem [shape: f32[16,64], index: 3, kind: output, shape index: {}]  }
   0x1   :  { %v23_v0 = vld [vmem:[%s221_s1] sm:$0xff]  ;;  %v24_v1 = vld [vmem:[%s221_s1 + $0x8] sm:$0xff]  ;;  %v25_v2 = vld [vmem:[%s221_s1 + $0x10] sm:$0xff]  ;;  %20 = vst.msk [vmem:[#allocation2 + $0x8] sm:$0xff] %vm18_vm1, %v165_v3 }
   0x2   :  { %19 = vst.msk [vmem:[#allocation2] sm:$0xff] %vm18_vm1, %v165_v3  ;;  %v156_v4 = vpack.c.bf16 %v24_v1, %v23_v0  ;;  %v26_v5 = vld [vmem:[%s221_s1 + $0x18] sm:$0xff]  ;;  %v21_v6 = vld [vmem:[%s222_s0] sm:$0xff]  ;;  %v22_v8 = vld [vmem:[%s222_s0 + $0x8] sm:$0xff] }
   0x3   :  { %v160_v7 = vpack.c.bf16 %v26_v5, %v25_v2  ;;  %153 = vmatprep.mubr.msk.f32.mxu0 %vm29_vm0, %v21_v6  ;;  %v138_v15 = vld [vmem:[%s223_s2] ss:$0 sm:$0xff] }
   0x4   :  { %157 = vmatprep.subr.bf16.mxu0 %v156_v4 }
   0x5   :  { %159 = vmatpush3.bf16.msra.mxu0 %v156_v4 }
   0x6   :  { %161 = vmatprep.subr.bf16.mxu0 %v160_v7 }
   0x8   :  { %v28_v9 = vld [vmem:[#allocation2 + $0x8] sm:$0xff] }
   0x9   :  { %163 = vmatpush3.bf16.msra.mxu0 %v160_v7  ;;  %v27_v10 = vld [vmem:[#allocation2] sm:$0xff] }
   0xc   :  { %154 = vmatmul.mubr.msk.f32.vlgmr.msra.gmra.mrb[0].mxu0 %vm29_vm0, %v22_v8 }
  0xdf   :  { %v155_v11 = vpop.f32.mrb[0].mxu0 }
  0xe0   :  { %v112_v12 = vadd.f32 %v155_v11, %v28_v9  ;;  %v102_v13 = vpop.f32.mrb[1].mxu0 }
  0xe1   :  { %v111_v14 = vadd.f32 %v102_v13, %v27_v10 }
  0xe2   :  { %115 = vst.msk [vmem:[#allocation2 + $0x8] sm:$0xff] %vm18_vm1, %v112_v12 }
  0xe3   :  { %114 = vst.msk [vmem:[#allocation2] sm:$0xff] %vm18_vm1, %v111_v14 }
  0xe9   :  { %v120_v16 = vld [vmem:[#allocation2 + $0x8] sm:$0xff] }
  0xea   :  { %v129_v17 = vadd.f32 %v138_v15, %v120_v16  ;;  %v119_v18 = vld [vmem:[#allocation2] sm:$0xff] }
  0xeb   :  { %v128_v19 = vadd.f32 %v138_v15, %v119_v18 }
  0xec   :  { %131 = vst.msk [vmem:[%s224_s3 + $0x8] sm:$0xff] %vm18_vm1, %v129_v17 }
  0xed   :  { %130 = vst.msk [vmem:[%s224_s3] sm:$0xff] %vm18_vm1, %v128_v19 }

// kernel: transformer_forward.35
= control target key start
LH: loop header
LB: loop body
LE: loop exit
PB: predicated region body
PF: predicated region fallthrough
CT: control target
= control target key end

     0   :  { %vm18_vm0 = vcmask 261120   ;;  %s118_s0 = inlined_call_operand.vmem [shape: f32[16,32], index: 0, kind: input, shape index: {}]   ;;  %s119_s1 = inlined_call_operand.vmem [shape: f32[1,32], index: 1, kind: input, shape index: {}]   ;;  %s120_s2 = inlined_call_operand.vmem [shape: f32[1,32], index: 2, kind: input, shape index: {}]   ;;  %s121_s3 = inlined_call_operand.vmem [shape: f32[16,32], index: 3, kind: output, shape index: {}]  }
   0x1   :  { %v14_v0 = vld [vmem:[%s118_s0] sm:$0xff]  ;;  %v15_v1 = vld [vmem:[%s118_s0 + $0x8] sm:$0xff] }
   0x2   :  { %v19_v2 = vsel %vm18_vm0, %v14_v0, 0.0  ;;  %v22_v3 = vsel %vm18_vm0, %v15_v1, 0.0  ;;  %v68_v21 = vld [vmem:[%s119_s1] ss:$0 sm:$0xff] }
   0x3   :  { %20 = vadd.xlane.f32.xlu0 %v19_v2  ;;  %v69_v23 = vld [vmem:[%s120_s2] ss:$0 sm:$0xff] }
   0x7   :  { %23 = vadd.xlane.f32.xlu0 %v22_v3 }
  0x90   :  { %v21_v4 = vpop.xlane.xlu0 %20 }
  0x91   :  { %v26_v5 = vmul.f32 0.03125, %v21_v4 }
  0x93   :  { %v28_v6 = vsub.f32 %v14_v0, %v26_v5 }
  0x94   :  { %v24_v7 = vpop.xlane.xlu0 %23 }
  0x95   :  { %v27_v8 = vmul.f32 0.03125, %v24_v7  ;;  %v30_v9 = vmul.f32 %v28_v6, %v28_v6 }
  0x97   :  { %v29_v10 = vsub.f32 %v15_v1, %v27_v8  ;;  %v32_v11 = vsel %vm18_vm0, %v30_v9, 0.0 }
  0x98   :  { %33 = vadd.xlane.f32.xlu1 %v32_v11 }
  0x99   :  { %v31_v12 = vmul.f32 %v29_v10, %v29_v10 }
  0x9b   :  { %v35_v13 = vsel %vm18_vm0, %v31_v12, 0.0 }
  0x9c   :  { %36 = vadd.xlane.f32.xlu1 %v35_v13 }
 0x125   :  { %v34_v14 = vpop.xlane.xlu1 %33 }
 0x126   :  { %v38_v15 = vmul.f32 0.03125, %v34_v14 }
 0x128   :  { %v40_v16 = vadd.f32 1e-05, %v38_v15 }
 0x129   :  { %v37_v17 = vpop.xlane.xlu1 %36 }
 0x12a   :  { %70 = vrsqrt.f32 %v40_v16  ;;  %v39_v18 = vmul.f32 0.03125, %v37_v17 }
 0x12c   :  { %v41_v19 = vadd.f32 1e-05, %v39_v18 }
 0x12e   :  { %72 = vrsqrt.f32 %v41_v19 }
 0x134   :  { %v71_v20 = vpop.eup %70 }
 0x135   :  { %v44_v22 = vmul.f32 %v71_v20, %v28_v6 }
 0x137   :  { %v52_v24 = vmul.f32 %v68_v21, %v44_v22 }
 0x138   :  { %v73_v25 = vpop.eup %72 }
 0x139   :  { %v60_v26 = vadd.f32 %v69_v23, %v52_v24  ;;  %v45_v27 = vmul.f32 %v73_v25, %v29_v10 }
 0x13b   :  { %62 = vst.msk [vmem:[%s121_s3] sm:$0xff] %vm18_vm0, %v60_v26  ;;  %v53_v28 = vmul.f32 %v68_v21, %v45_v27 }
 0x13d   :  { %v61_v29 = vadd.f32 %v69_v23, %v53_v28 }
 0x13f   :  { %63 = vst.msk [vmem:[%s121_s3 + $0x8] sm:$0xff] %vm18_vm0, %v61_v29 }

// kernel: transformer_forward.30
= control target key start
LH: loop header
LB: loop body
LE: loop exit
PB: predicated region body
PF: predicated region fallthrough
CT: control target
= control target key end

     0   :  { %vm39_vm0 = vcmask 261120   ;;  %vm138_vm1 = vcmask 523264   ;;  %s463_s1 = inlined_call_operand.vmem [shape: f32[32,64], index: 1, kind: input, shape index: {}]   ;;  %s464_s0 = inlined_call_operand.vmem [shape: f32[16,32], index: 0, kind: input, shape index: {}]   ;;  %s465_s3 = inlined_call_operand.vmem [shape: f32[64,32], index: 3, kind: input, shape index: {}]   ;;  %s466_s2 = inlined_call_operand.vmem [shape: f32[1,64], index: 2, kind: input, shape index: {}]   ;;  %s467_s4 = inlined_call_operand.vmem [shape: f32[1,32], index: 4, kind: input, shape index: {}]   ;;  %s468_s5 = inlined_call_operand.vmem [shape: f32[1,32], index: 5, kind: input, shape index: {}]   ;;  %s469_s6 = inlined_call_operand.vmem [shape: f32[1,32], index: 6, kind: input, shape index: {}]   ;;  %s470_s7 = inlined_call_operand.vmem [shape: f32[16,32], index: 7, kind: output, shape index: {}]  }
   0x1   :  { %v28_v0 = vld [vmem:[%s463_s1] sm:$0xff]  ;;  %v29_v1 = vld [vmem:[%s463_s1 + $0x8] sm:$0xff]  ;;  %v30_v2 = vld [vmem:[%s463_s1 + $0x10] sm:$0xff] }
   0x2   :  { %v327_v3 = vpack.c.bf16 %v29_v1, %v28_v0  ;;  %v31_v4 = vld [vmem:[%s463_s1 + $0x18] sm:$0xff]  ;;  %v26_v5 = vld [vmem:[%s464_s0] sm:$0xff]  ;;  %v124_v8 = vld [vmem:[%s465_s3 + $0x8] sm:$0xff] }
   0x3   :  { %v331_v6 = vpack.c.bf16 %v31_v4, %v30_v2  ;;  %305 = vmatprep.mubr.msk.f32.mxu0 %vm39_vm0, %v26_v5  ;;  %v123_v7 = vld [vmem:[%s465_s3] sm:$0xff]  ;;  %v125_v9 = vld [vmem:[%s465_s3 + $0x10] sm:$0xff]  ;;  %v126_v11 = vld [vmem:[%s465_s3 + $0x18] sm:$0xff] }
   0x4   :  { %328 = vmatprep.subr.bf16.mxu0 %v327_v3  ;;  %v335_v10 = vpack.c.bf16 %v124_v8, %v123_v7  ;;  %v339_v12 = vpack.c.bf16 %v126_v11, %v125_v9  ;;  %v127_v13 = vld [vmem:[%s465_s3 + $0x20] sm:$0xff]  ;;  %v128_v14 = vld [vmem:[%s465_s3 + $0x28] sm:$0xff]  ;;  %v129_v17 = vld [vmem:[%s465_s3 + $0x30] sm:$0xff] }
   0x5   :  { %330 = vmatpush3.bf16.msra.mxu0 %v327_v3  ;;  %v343_v15 = vpack.c.bf16 %v128_v14, %v127_v13  ;;  %v27_v16 = vld [vmem:[%s464_s0 + $0x8] sm:$0xff]  ;;  %v130_v18 = vld [vmem:[%s465_s3 + $0x38] sm:$0xff]  ;;  %v273_v20 = vld [vmem:[%s466_s2] ss:$0 sm:$0xff] }
   0x6   :  { %332 = vmatprep.subr.bf16.mxu0 %v331_v6  ;;  %336 = vmatprep.subr.bf16.mxu1 %v335_v10  ;;  %v347_v19 = vpack.c.bf16 %v130_v18, %v129_v17  ;;  %v276_v27 = vld [vmem:[%s467_s4] ss:$0 sm:$0xff] }
   0x7   :  { %338 = vmatpush3.bf16.msra.mxu1 %v335_v10  ;;  %v279_v53 = vld [vmem:[%s468_s5] ss:$0 sm:$0xff] }
   0x8   :  { %340 = vmatprep.subr.bf16.mxu1 %v339_v12  ;;  %v280_v55 = vld [vmem:[%s469_s6] ss:$0 sm:$0xff] }
   0x9   :  { %334 = vmatpush3.bf16.msra.mxu0 %v331_v6 }
   0xb   :  { %342 = vmatpush3.bf16.msra.mxu1 %v339_v12 }
   0xc   :  { %306 = vmatmul.mubr.msk.f32.vlgmr.msra.gmra.mrb[0].mxu0 %vm39_vm0, %v27_v16  ;;  %344 = vmatprep.subr.bf16.mxu1 %v343_v15 }
   0xf   :  { %346 = vmatpush3.bf16.msra.mxu1 %v343_v15 }
  0x10   :  { %348 = vmatprep.subr.bf16.mxu1 %v347_v19 }
  0x13   :  { %350 = vmatpush3.bf16.msra.mxu1 %v347_v19 }
  0xdf   :  { %v307_v21 = vpop.f32.mrb[0].mxu0 }
  0xe0   :  { %v118_v22 = vadd.f32 %v307_v21, %v273_v20  ;;  %v112_v23 = vpop.f32.mrb[1].mxu0 }
  0xe1   :  { %v113_v24 = vadd.f32 %v273_v20, %v112_v23 }
  0xe2   :  { %v122_v26 = vmax.f32 %v118_v22, 0.0 }
  0xe3   :  { %v121_v25 = vmax.f32 %v113_v24, 0.0 }
  0xe5   :  { %324 = vmatprep.mubr.msk.f32.mxu1 %vm138_vm1, %v121_v25 }
  0xe6   :  { %325 = vmatmul.mubr.msk.f32.vlgmr.msra.gmra.mrb[0].mxu1 %vm138_vm1, %v122_v26 }
 0x1b9   :  { %v326_v28 = vpop.f32.mrb[0].mxu1 }
 0x1ba   :  { %v211_v29 = vpop.f32.mrb[1].mxu1  ;;  %v217_v30 = vadd.f32 %v326_v28, %v276_v27 }
 0x1bb   :  { %v212_v31 = vadd.f32 %v276_v27, %v211_v29 }
 0x1bc   :  { %v221_v34 = vadd.f32 %v217_v30, %v27_v16 }
 0x1bd   :  { %v220_v32 = vadd.f32 %v212_v31, %v26_v5 }
 0x1be   :  { %v227_v35 = vsel %vm39_vm0, %v221_v34, 0.0 }
 0x1bf   :  { %v224_v33 = vsel %vm39_vm0, %v220_v32, 0.0 }
 0x1c0   :  { %225 = vadd.xlane.f32.xlu0 %v224_v33 }
 0x1c4   :  { %228 = vadd.xlane.f32.xlu0 %v227_v35 }
 0x24d   :  { %v226_v36 = vpop.xlane.xlu0 %225 }
 0x24e   :  { %v231_v37 = vmul.f32 0.03125, %v226_v36 }
 0x250   :  { %v233_v38 = vsub.f32 %v220_v32, %v231_v37 }
 0x251   :  { %v229_v39 = vpop.xlane.xlu0 %228 }
 0x252   :  { %v232_v40 = vmul.f32 0.03125, %v229_v39  ;;  %v235_v41 = vmul.f32 %v233_v38, %v233_v38 }
 0x254   :  { %v234_v42 = vsub.f32 %v221_v34, %v232_v40  ;;  %v237_v43 = vsel %vm39_vm0, %v235_v41, 0.0 }
 0x255   :  { %238 = vadd.xlane.f32.xlu1 %v237_v43 }
 0x256   :  { %v236_v44 = vmul.f32 %v234_v42, %v234_v42 }
 0x258   :  { %v240_v45 = vsel %vm39_vm0, %v236_v44, 0.0 }
 0x259   :  { %241 = vadd.xlane.f32.xlu1 %v240_v45 }
 0x2e2   :  { %v239_v46 = vpop.xlane.xlu1 %238 }
 0x2e3   :  { %v243_v47 = vmul.f32 0.03125, %v239_v46 }
 0x2e5   :  { %v245_v48 = vadd.f32 1e-05, %v243_v47 }
 0x2e6   :  { %v242_v49 = vpop.xlane.xlu1 %241 }
 0x2e7   :  { %351 = vrsqrt.f32 %v245_v48  ;;  %v244_v50 = vmul.f32 0.03125, %v242_v49 }
 0x2e9   :  { %v246_v51 = vadd.f32 1e-05, %v244_v50 }
 0x2eb   :  { %353 = vrsqrt.f32 %v246_v51 }
 0x2f1   :  { %v352_v52 = vpop.eup %351 }
 0x2f2   :  { %v249_v54 = vmul.f32 %v352_v52, %v233_v38 }
 0x2f4   :  { %v257_v56 = vmul.f32 %v279_v53, %v249_v54 }
 0x2f5   :  { %v354_v57 = vpop.eup %353 }
 0x2f6   :  { %v265_v58 = vadd.f32 %v280_v55, %v257_v56  ;;  %v250_v59 = vmul.f32 %v354_v57, %v234_v42 }
 0x2f8   :  { %267 = vst.msk [vmem:[%s470_s7] sm:$0xff] %vm39_vm0, %v265_v58  ;;  %v258_v60 = vmul.f32 %v279_v53, %v250_v59 }
 0x2fa   :  { %v266_v61 = vadd.f32 %v280_v55, %v258_v60 }
 0x2fc   :  { %268 = vst.msk [vmem:[%s470_s7 + $0x8] sm:$0xff] %vm39_vm0, %v266_v61 }

// kernel: transformer_forward.53
= control target key start
LH: loop header
LB: loop body
LE: loop exit
PB: predicated region body
PF: predicated region fallthrough
CT: control target
= control target key end

     0   :  { %vm30_vm0 = vcmask 261120   ;;  %vm19_vm1 = vcmask 818176   ;;  %v205_v6 = vmov 0.0   ;;  %s270_s0 = inlined_call_operand.vmem [shape: f32[16,32], index: 0, kind: input, shape index: {}]   ;;  %s271_s1 = inlined_call_operand.vmem [shape: f32[32,100], index: 1, kind: input, shape index: {}]   ;;  %s272_s2 = inlined_call_operand.vmem [shape: f32[1,100], index: 2, kind: input, shape index: {}]   ;;  %s273_s3 = inlined_call_operand.hbm [shape: f32[16,100], index: 3, kind: output, shape index: {}]  }
   0x1   :  { %v24_v0 = vld [vmem:[%s271_s1] sm:$0xff]  ;;  %v25_v1 = vld [vmem:[%s271_s1 + $0x8] sm:$0xff]  ;;  %v26_v2 = vld [vmem:[%s271_s1 + $0x10] sm:$0xff]  ;;  %21 = vst.msk [vmem:[#allocation2 + $0x8] sm:$0xff] %vm19_vm1, %v205_v6 }
   0x2   :  { %v169_v3 = vpack.c.bf16 %v25_v1, %v24_v0  ;;  %v27_v4 = vld [vmem:[%s271_s1 + $0x18] sm:$0xff]  ;;  %v22_v5 = vld [vmem:[%s270_s0] sm:$0xff]  ;;  %20 = vst.msk [vmem:[#allocation2] sm:$0xff] %vm19_vm1, %v205_v6 }
   0x3   :  { %v173_v7 = vpack.c.bf16 %v27_v4, %v26_v2  ;;  %166 = vmatprep.mubr.msk.f32.mxu0 %vm30_vm0, %v22_v5 }
   0x4   :  { %8 = vsyncpa [#allocation4], 0  ;;  %170 = vmatprep.subr.bf16.mxu0 %v169_v3  ;;  %v23_v8 = vld [vmem:[%s270_s0 + $0x8] sm:$0xff]  ;;  %v151_v15 = vld [vmem:[%s272_s2] ss:$0 sm:$0xff]  ;;  %s206_s25 = smov [#allocation3]  }
   0x5   :  { %172 = vmatpush3.bf16.msra.mxu0 %v169_v3  ;;  %s138_s26 = sshll.u32 %s206_s25, 4  ;;  %s139_s26 = int_to_ptr.vmem [resolvable:$true] %s138_s26 }
   0x6   :  { %174 = vmatprep.subr.bf16.mxu0 %v173_v7  ;;  %s181_s0 = scalar_lea.vmem %s139_s26, 256  ;;  %p186_p1 = scmp.lt.s32.totalorder %s139_s26, %s139_s26 }
   0x7   :  { %p182_p0 = scmp.ne.s32.totalorder %s139_s26, %s181_s0  ;;  %p187_p2 = scmp.lt.s32.totalorder %s181_s0, %s181_s0 }
   0x8   :  { %v29_v9 = vld [vmem:[#allocation2 + $0x8] sm:$0xff] }
   0x9   :  { %176 = vmatpush3.bf16.msra.mxu0 %v173_v7  ;;  %v28_v10 = vld [vmem:[#allocation2] sm:$0xff]  ;;  %p188_p3 = por %p187_p2, %p186_p1 }
   0xb   :  { %p189_p4 = pnand %p188_p3, %p182_p0 }
   0xc   :  { %167 = vmatmul.mubr.msk.f32.vlgmr.msra.gmra.mrb[0].mxu0 %vm30_vm0, %v23_v8 }
  0xdf   :  { %v168_v11 = vpop.f32.mrb[0].mxu0 }
  0xe0   :  { %v113_v12 = vadd.f32 %v168_v11, %v29_v9  ;;  %v103_v13 = vpop.f32.mrb[1].mxu0 }
  0xe1   :  { %v112_v14 = vadd.f32 %v103_v13, %v28_v10 }
  0xe2   :  { %116 = vst.msk [vmem:[#allocation2 + $0x8] sm:$0xff] %vm19_vm1, %v113_v12 }
  0xe3   :  { %115 = vst.msk [vmem:[#allocation2] sm:$0xff] %vm19_vm1, %v112_v14 }
  0xe9   :  { %v121_v16 = vld [vmem:[#allocation2 + $0x8] sm:$0xff] }
  0xea   :  { %v120_v17 = vld [vmem:[#allocation2] sm:$0xff]  ;;  %v130_v18 = vadd.f32 %v151_v15, %v121_v16 }
  0xeb   :  { %v129_v19 = vadd.f32 %v151_v15, %v120_v17 }
  0xec   :  { %132 = vst.msk [vmem:[#allocation3 + $0x8] sm:$0xff] %vm19_vm1, %v130_v18 }
  0xed   :  { %131 = vst.msk [vmem:[#allocation3] sm:$0xff] %vm19_vm1, %v129_v19 }
  0xee   :  { %192 = shalt.err (!%p189_p4)
}
  0xef   :  { %s193_s28 = scalar_lea.hbm %s273_s3, 256 }
  0xf0   :  { %p194_p5 = scmp.ne.s32.totalorder %s273_s3, %s193_s28  ;;  %p197_p6 = scmp.lt.u32.totalorder %s193_s28, %s273_s3 }
  0xf2   :  { %p199_p7 = pnand %p197_p6, %p194_p5 }
  0xf4   :  { %202 = shalt.err (!%p199_p7)
}
  0xf5   :  { %s207_s6 = smov 128   ;;  %s208_s7 = smov 8  }
  0xf6   :  { %144 = dma.vmem_to_hbm [thread:$0]  %s139_s26, 256, %s273_s3, [#allocation4], %s207_s6, %s207_s6, %s208_s7  }
  0xf7   :  { %203 = dma.done.wait [#allocation4], 256  }
  0xf8   :  { %204 = vsyncadd [#allocation4], 4294967040 }
  0xf9   :  { %148 = vsyncpa [#allocation4], 1 }

</bundles_post_ra>
